<compile_context>
chip_gen: v7x
topology: tpu7x:2x2x1
jax: 0.10.0
libtpu: 0.0.40
codegen_flags: <defaults>
</compile_context>

<pallas_src>
import jax
import jax.numpy as jnp
from jax import lax
from jax.experimental import pallas as pl
from jax.experimental.pallas import tpu as pltpu


def bert_embeddings_kernel(ids_ref,        # scalar prefetch: (B*S,) int32 in SMEM
                           tt_ref,         # (1, TS, 1) int32   token-type ids tile
                           word_hbm,       # (V, H) in HBM      (pl.ANY, manual DMA)
                           pos_ref,        # (TS, H)            position rows tile
                           ttype_ref,      # (2, H)             token-type table
                           gamma_ref,      # (1, H)
                           beta_ref,       # (1, H)
                           out_ref,        # (1, TS, H)
                           gbuf,           # VMEM scratch (2, TS, H) double-buffered gather
                           sem):           # DMA semaphores (2,)   one per slot
    b = pl.program_id(0)
    t = pl.program_id(1)
    n_tiles = pl.num_programs(1)
    TS = gbuf.shape[1]
    V = word_hbm.shape[0]
    S = n_tiles * TS

    slot = lax.rem(t, 2)
    nxt_slot = 1 - slot

    # --- word-row gather: TS row-DMAs, all signalling one shared semaphore ---
    def issue_gather(dst_slot, base):
        def one(i):
            row = jnp.maximum(jnp.minimum(ids_ref[base + i], V - 1), 0)
            pltpu.make_async_copy(word_hbm.at[pl.ds(row, 1)],
                                  gbuf.at[dst_slot, pl.ds(i, 1)],
                                  sem.at[dst_slot]).start()
        if TS <= 32:                      # small tiles: unroll the issue loop
            for i in range(TS):
                one(i)
        else:                             # large tiles: keep the i-stream small
            @pl.loop(0, TS)
            def _(i):
                one(i)

    # Prime: first seq-tile of this batch row gathers its own word rows.
    @pl.when(t == 0)
    def _():
        issue_gather(slot, b * S)

    # Cross-step prefetch: issue NEXT tile's gather before computing this one.
    @pl.when(t + 1 < n_tiles)
    def _():
        issue_gather(nxt_slot, b * S + (t + 1) * TS)

    # --- overlap with the in-flight DMAs: position + token-type (VPU only) ---
    tt = jnp.maximum(jnp.minimum(tt_ref[0], 1), 0).astype(jnp.float32)   # (TS,1)
    t0 = ttype_ref[0:1, :].astype(jnp.float32)                            # (1,H)
    t1 = ttype_ref[1:2, :].astype(jnp.float32)
    partial = pos_ref[...].astype(jnp.float32) + (t0 + tt * (t1 - t0))    # (TS,H)

    # --- single aggregate wait: (TS, H) bytes on this slot's semaphore ---
    pltpu.make_async_copy(word_hbm.at[pl.ds(0, TS)],
                          gbuf.at[slot],
                          sem.at[slot]).wait()

    x = gbuf[slot].astype(jnp.float32) + partial                          # (TS,H)

    # --- LayerNorm over hidden dim, eps = 1e-12 (biased variance), fp32 ---
    mean = jnp.mean(x, axis=-1, keepdims=True)
    xc = x - mean
    var = jnp.mean(xc * xc, axis=-1, keepdims=True)
    y = xc * lax.rsqrt(var + 1e-12)
    y = y * gamma_ref[...].astype(jnp.float32) + beta_ref[...].astype(jnp.float32)

    # Dropout(p=0.1): identity in eval mode.
    out_ref[0] = y.astype(out_ref.dtype)                 # lane-dense (TS,H) store


def _pick_tile(S, cap=256):
    # Largest divisor of S that is <= cap and sublane-friendly (multiple of 8).
    for cand in range(min(S, cap), 0, -1):
        if S % cand == 0 and (cand % 8 == 0 or cand == S):
            return cand
    return S


def bert_embeddings(input_ids, token_type_ids, word_emb, pos_emb, ttype_emb,
                    gamma, beta, *, tile_s=None, out_dtype=None):
    B, S = input_ids.shape
    V, H = word_emb.shape
    P = pos_emb.shape[0]
    assert S <= P, "sequence length must not exceed max_position_embeddings"

    if token_type_ids is None:
        token_type_ids = jnp.zeros_like(input_ids)
    if out_dtype is None:
        out_dtype = word_emb.dtype          # bf16 table -> bf16 output (free HBM win)
    if tile_s is None:
        tile_s = _pick_tile(S)              # large tiles amortize per-step overhead
    assert S % tile_s == 0, "S must be divisible by the sequence tile"
    n_tiles = S // tile_s

    ids_flat = input_ids.reshape(-1).astype(jnp.int32)           # SMEM scalar prefetch
    tt3 = token_type_ids.reshape(B, S, 1).astype(jnp.int32)
    gamma2 = gamma.reshape(1, H)
    beta2 = beta.reshape(1, H)

    return pl.pallas_call(
        bert_embeddings_kernel,
        out_shape=jax.ShapeDtypeStruct((B, S, H), out_dtype),
        grid_spec=pltpu.PrefetchScalarGridSpec(
            num_scalar_prefetch=1,
            grid=(B, n_tiles),
            in_specs=[
                pl.BlockSpec((1, tile_s, 1), lambda b, t, ids: (b, t, 0)),  # token_type_ids
                pl.BlockSpec(memory_space=pl.ANY),                          # word table (HBM)
                pl.BlockSpec((tile_s, H), lambda b, t, ids: (t, 0)),        # position rows
                pl.BlockSpec((2, H), lambda b, t, ids: (0, 0)),             # token-type table
                pl.BlockSpec((1, H), lambda b, t, ids: (0, 0)),             # LayerNorm weight
                pl.BlockSpec((1, H), lambda b, t, ids: (0, 0)),             # LayerNorm bias
            ],
            out_specs=pl.BlockSpec((1, tile_s, H), lambda b, t, ids: (b, t, 0)),
            scratch_shapes=[
                pltpu.VMEM((2, tile_s, H), word_emb.dtype),   # double-buffered gather
                pltpu.SemaphoreType.DMA((2,)),                # one shared sem per slot
            ],
        ),
        compiler_params=pltpu.CompilerParams(
            # batch axis parallel (v7x 2-TC sharding), seq-tile axis sequential
            # per core so the cross-step gather prefetch is well defined.
            dimension_semantics=("parallel", "arbitrary")),
    )(ids_flat, tt3, word_emb, pos_emb, ttype_emb, gamma2, beta2)


def reference(input_ids, token_type_ids, word_emb, pos_emb, ttype_emb, gamma, beta):
    B, S = input_ids.shape
    positions = jnp.arange(S, dtype=jnp.int32)[None, :].repeat(B, axis=0)
    x = word_emb[input_ids] + pos_emb[positions] + ttype_emb[token_type_ids]
    mean = jnp.mean(x, axis=-1, keepdims=True)
    var = jnp.mean((x - mean) ** 2, axis=-1, keepdims=True)
    return (x - mean) / jnp.sqrt(var + 1e-12) * gamma + beta


if __name__ == "__main__":
    # Small synthetic config consistent with the module's __init__.
    # H chosen as a multiple of 128 (lane-dense output); S split into 2 tiles
    # so the cross-step gather prefetch path is exercised.
    B, S = 2, 16           # batch, sequence length
    V = 64                 # vocab_size
    P = 16                 # max_position_embeddings
    H = 128                # hidden_size

    key = jax.random.PRNGKey(0)
    k_ids, k_tt, k_w, k_p, k_t, k_g, k_b = jax.random.split(key, 7)

    input_ids = jax.random.randint(k_ids, (B, S), 0, V, dtype=jnp.int32)
    token_type_ids = jax.random.randint(k_tt, (B, S), 0, 2, dtype=jnp.int32)

    word_emb = 0.02 * jax.random.normal(k_w, (V, H), dtype=jnp.float32)
    pos_emb = 0.02 * jax.random.normal(k_p, (P, H), dtype=jnp.float32)
    ttype_emb = 0.02 * jax.random.normal(k_t, (2, H), dtype=jnp.float32)
    gamma = jnp.ones((H,), dtype=jnp.float32) + 0.01 * jax.random.normal(k_g, (H,))
    beta = 0.01 * jax.random.normal(k_b, (H,), dtype=jnp.float32)

    out = bert_embeddings(input_ids, token_type_ids, word_emb, pos_emb,
                          ttype_emb, gamma, beta, tile_s=8)
    out = jax.block_until_ready(out)

    ref = reference(input_ids, token_type_ids, word_emb, pos_emb,
                    ttype_emb, gamma, beta)
    assert out.shape == (B, S, H)
    assert jnp.allclose(out, ref, atol=1e-5, rtol=1e-5)

    print("KERNEL_OK")
</pallas_src>

<mosaic_0001>
module attributes {stable_mosaic.version = 11 : i64} {
  func.func @bert_embeddings_kernel(%arg0: i32, %arg1: i32, %arg2: memref<32xi32, #tpu.memory_space<smem>>, %arg3: memref<1x8x1xi32, #tpu.memory_space<vmem>>, %arg4: memref<64x128xf32, #tpu.memory_space<any>>, %arg5: memref<8x128xf32, #tpu.memory_space<vmem>>, %arg6: memref<2x128xf32, #tpu.memory_space<vmem>>, %arg7: memref<1x128xf32, #tpu.memory_space<vmem>>, %arg8: memref<1x128xf32, #tpu.memory_space<vmem>>, %arg9: memref<1x8x128xf32, #tpu.memory_space<vmem>>, %arg10: memref<2x8x128xf32, #tpu.memory_space<vmem>>, %arg11: memref<2x!tpu.dma_semaphore, #tpu.memory_space<semaphore_mem>>) attributes {dimension_semantics = [#tpu.dimension_semantics<parallel>, #tpu.dimension_semantics<arbitrary>], iteration_bounds = array<i64: 2, 2>, scalar_prefetch = 1 : i64, scratch_operands = 2 : i64, tpu.core_type = #tpu.core_type<tc>, window_params = [{transform_indices = @transform_0, window_bounds = array<i64: 1, 8, 1>}, {}, {transform_indices = @transform_2, window_bounds = array<i64: 8, 128>}, {pipeline_mode = #tpu.pipeline_mode<synchronous>, transform_indices = @transform_3, window_bounds = array<i64: 2, 128>}, {pipeline_mode = #tpu.pipeline_mode<synchronous>, transform_indices = @transform_4, window_bounds = array<i64: 1, 128>}, {pipeline_mode = #tpu.pipeline_mode<synchronous>, transform_indices = @transform_5, window_bounds = array<i64: 1, 128>}, {transform_indices = @transform_6, window_bounds = array<i64: 1, 8, 128>}]} {
    %c2_i32 = arith.constant 2 : i32
    %0 = arith.remsi %arg1, %c2_i32 : i32
    %c1_i32 = arith.constant 1 : i32
    %1 = arith.subi %c1_i32, %0 : i32
    %c0_i32 = arith.constant 0 : i32
    %2 = arith.cmpi eq, %arg1, %c0_i32 : i32
    %3 = arith.extui %2 : i1 to i32
    %c0_i32_0 = arith.constant 0 : i32
    %4 = arith.cmpi ne, %3, %c0_i32_0 : i32
    scf.if %4 {
      %c16_i32 = arith.constant 16 : i32
      %60 = arith.muli %arg0, %c16_i32 : i32
      %c0_i32_30 = arith.constant 0 : i32
      %61 = arith.addi %60, %c0_i32_30 : i32
      %62 = arith.index_cast %61 : i32 to index
      %63 = memref.load %arg2[%62] : memref<32xi32, #tpu.memory_space<smem>>
      %c63_i32 = arith.constant 63 : i32
      %64 = arith.minsi %63, %c63_i32 : i32
      %c0_i32_31 = arith.constant 0 : i32
      %65 = arith.maxsi %64, %c0_i32_31 : i32
      %c0_i32_32 = arith.constant 0 : i32
      %66 = tpu.memref_slice %arg4[%65, %c0_i32_32] : memref<64x128xf32, #tpu.memory_space<any>> -> memref<1x128xf32, #tpu.memory_space<any>>
      %c0_i32_33 = arith.constant 0 : i32
      %c0_i32_34 = arith.constant 0 : i32
      %67 = tpu.memref_slice %arg10[%0, %c0_i32_33, %c0_i32_34] : memref<2x8x128xf32, #tpu.memory_space<vmem>> -> memref<1x1x128xf32, #tpu.memory_space<vmem>>
      %68 = tpu.memref_squeeze %67 : memref<1x1x128xf32, #tpu.memory_space<vmem>> -> memref<1x128xf32, #tpu.memory_space<vmem>>
      %69 = tpu.memref_slice %arg11[%0] : memref<2x!tpu.dma_semaphore, #tpu.memory_space<semaphore_mem>> -> memref<1x!tpu.dma_semaphore, #tpu.memory_space<semaphore_mem>>
      %70 = tpu.memref_squeeze %69 : memref<1x!tpu.dma_semaphore, #tpu.memory_space<semaphore_mem>> -> memref<!tpu.dma_semaphore, #tpu.memory_space<semaphore_mem>>
      tpu.enqueue_dma source(%66 : memref<1x128xf32, #tpu.memory_space<any>>) target(%68 : memref<1x128xf32, #tpu.memory_space<vmem>>) target_semaphore(%70 : memref<!tpu.dma_semaphore, #tpu.memory_space<semaphore_mem>>)
      %c1_i32_35 = arith.constant 1 : i32
      %71 = arith.addi %60, %c1_i32_35 : i32
      %72 = arith.index_cast %71 : i32 to index
      %73 = memref.load %arg2[%72] : memref<32xi32, #tpu.memory_space<smem>>
      %c63_i32_36 = arith.constant 63 : i32
      %74 = arith.minsi %73, %c63_i32_36 : i32
      %c0_i32_37 = arith.constant 0 : i32
      %75 = arith.maxsi %74, %c0_i32_37 : i32
      %c0_i32_38 = arith.constant 0 : i32
      %76 = tpu.memref_slice %arg4[%75, %c0_i32_38] : memref<64x128xf32, #tpu.memory_space<any>> -> memref<1x128xf32, #tpu.memory_space<any>>
      %c1_i32_39 = arith.constant 1 : i32
      %c0_i32_40 = arith.constant 0 : i32
      %77 = tpu.memref_slice %arg10[%0, %c1_i32_39, %c0_i32_40] : memref<2x8x128xf32, #tpu.memory_space<vmem>> -> memref<1x1x128xf32, #tpu.memory_space<vmem>>
      %78 = tpu.memref_squeeze %77 : memref<1x1x128xf32, #tpu.memory_space<vmem>> -> memref<1x128xf32, #tpu.memory_space<vmem>>
      %79 = tpu.memref_slice %arg11[%0] : memref<2x!tpu.dma_semaphore, #tpu.memory_space<semaphore_mem>> -> memref<1x!tpu.dma_semaphore, #tpu.memory_space<semaphore_mem>>
      %80 = tpu.memref_squeeze %79 : memref<1x!tpu.dma_semaphore, #tpu.memory_space<semaphore_mem>> -> memref<!tpu.dma_semaphore, #tpu.memory_space<semaphore_mem>>
      tpu.enqueue_dma source(%76 : memref<1x128xf32, #tpu.memory_space<any>>) target(%78 : memref<1x128xf32, #tpu.memory_space<vmem>>) target_semaphore(%80 : memref<!tpu.dma_semaphore, #tpu.memory_space<semaphore_mem>>)
      %c2_i32_41 = arith.constant 2 : i32
      %81 = arith.addi %60, %c2_i32_41 : i32
      %82 = arith.index_cast %81 : i32 to index
      %83 = memref.load %arg2[%82] : memref<32xi32, #tpu.memory_space<smem>>
      %c63_i32_42 = arith.constant 63 : i32
      %84 = arith.minsi %83, %c63_i32_42 : i32
      %c0_i32_43 = arith.constant 0 : i32
      %85 = arith.maxsi %84, %c0_i32_43 : i32
      %c0_i32_44 = arith.constant 0 : i32
      %86 = tpu.memref_slice %arg4[%85, %c0_i32_44] : memref<64x128xf32, #tpu.memory_space<any>> -> memref<1x128xf32, #tpu.memory_space<any>>
      %c2_i32_45 = arith.constant 2 : i32
      %c0_i32_46 = arith.constant 0 : i32
      %87 = tpu.memref_slice %arg10[%0, %c2_i32_45, %c0_i32_46] : memref<2x8x128xf32, #tpu.memory_space<vmem>> -> memref<1x1x128xf32, #tpu.memory_space<vmem>>
      %88 = tpu.memref_squeeze %87 : memref<1x1x128xf32, #tpu.memory_space<vmem>> -> memref<1x128xf32, #tpu.memory_space<vmem>>
      %89 = tpu.memref_slice %arg11[%0] : memref<2x!tpu.dma_semaphore, #tpu.memory_space<semaphore_mem>> -> memref<1x!tpu.dma_semaphore, #tpu.memory_space<semaphore_mem>>
      %90 = tpu.memref_squeeze %89 : memref<1x!tpu.dma_semaphore, #tpu.memory_space<semaphore_mem>> -> memref<!tpu.dma_semaphore, #tpu.memory_space<semaphore_mem>>
      tpu.enqueue_dma source(%86 : memref<1x128xf32, #tpu.memory_space<any>>) target(%88 : memref<1x128xf32, #tpu.memory_space<vmem>>) target_semaphore(%90 : memref<!tpu.dma_semaphore, #tpu.memory_space<semaphore_mem>>)
      %c3_i32 = arith.constant 3 : i32
      %91 = arith.addi %60, %c3_i32 : i32
      %92 = arith.index_cast %91 : i32 to index
      %93 = memref.load %arg2[%92] : memref<32xi32, #tpu.memory_space<smem>>
      %c63_i32_47 = arith.constant 63 : i32
      %94 = arith.minsi %93, %c63_i32_47 : i32
      %c0_i32_48 = arith.constant 0 : i32
      %95 = arith.maxsi %94, %c0_i32_48 : i32
      %c0_i32_49 = arith.constant 0 : i32
      %96 = tpu.memref_slice %arg4[%95, %c0_i32_49] : memref<64x128xf32, #tpu.memory_space<any>> -> memref<1x128xf32, #tpu.memory_space<any>>
      %c3_i32_50 = arith.constant 3 : i32
      %c0_i32_51 = arith.constant 0 : i32
      %97 = tpu.memref_slice %arg10[%0, %c3_i32_50, %c0_i32_51] : memref<2x8x128xf32, #tpu.memory_space<vmem>> -> memref<1x1x128xf32, #tpu.memory_space<vmem>>
      %98 = tpu.memref_squeeze %97 : memref<1x1x128xf32, #tpu.memory_space<vmem>> -> memref<1x128xf32, #tpu.memory_space<vmem>>
      %99 = tpu.memref_slice %arg11[%0] : memref<2x!tpu.dma_semaphore, #tpu.memory_space<semaphore_mem>> -> memref<1x!tpu.dma_semaphore, #tpu.memory_space<semaphore_mem>>
      %100 = tpu.memref_squeeze %99 : memref<1x!tpu.dma_semaphore, #tpu.memory_space<semaphore_mem>> -> memref<!tpu.dma_semaphore, #tpu.memory_space<semaphore_mem>>
      tpu.enqueue_dma source(%96 : memref<1x128xf32, #tpu.memory_space<any>>) target(%98 : memref<1x128xf32, #tpu.memory_space<vmem>>) target_semaphore(%100 : memref<!tpu.dma_semaphore, #tpu.memory_space<semaphore_mem>>)
      %c4_i32 = arith.constant 4 : i32
      %101 = arith.addi %60, %c4_i32 : i32
      %102 = arith.index_cast %101 : i32 to index
      %103 = memref.load %arg2[%102] : memref<32xi32, #tpu.memory_space<smem>>
      %c63_i32_52 = arith.constant 63 : i32
      %104 = arith.minsi %103, %c63_i32_52 : i32
      %c0_i32_53 = arith.constant 0 : i32
      %105 = arith.maxsi %104, %c0_i32_53 : i32
      %c0_i32_54 = arith.constant 0 : i32
      %106 = tpu.memref_slice %arg4[%105, %c0_i32_54] : memref<64x128xf32, #tpu.memory_space<any>> -> memref<1x128xf32, #tpu.memory_space<any>>
      %c4_i32_55 = arith.constant 4 : i32
      %c0_i32_56 = arith.constant 0 : i32
      %107 = tpu.memref_slice %arg10[%0, %c4_i32_55, %c0_i32_56] : memref<2x8x128xf32, #tpu.memory_space<vmem>> -> memref<1x1x128xf32, #tpu.memory_space<vmem>>
      %108 = tpu.memref_squeeze %107 : memref<1x1x128xf32, #tpu.memory_space<vmem>> -> memref<1x128xf32, #tpu.memory_space<vmem>>
      %109 = tpu.memref_slice %arg11[%0] : memref<2x!tpu.dma_semaphore, #tpu.memory_space<semaphore_mem>> -> memref<1x!tpu.dma_semaphore, #tpu.memory_space<semaphore_mem>>
      %110 = tpu.memref_squeeze %109 : memref<1x!tpu.dma_semaphore, #tpu.memory_space<semaphore_mem>> -> memref<!tpu.dma_semaphore, #tpu.memory_space<semaphore_mem>>
      tpu.enqueue_dma source(%106 : memref<1x128xf32, #tpu.memory_space<any>>) target(%108 : memref<1x128xf32, #tpu.memory_space<vmem>>) target_semaphore(%110 : memref<!tpu.dma_semaphore, #tpu.memory_space<semaphore_mem>>)
      %c5_i32 = arith.constant 5 : i32
      %111 = arith.addi %60, %c5_i32 : i32
      %112 = arith.index_cast %111 : i32 to index
      %113 = memref.load %arg2[%112] : memref<32xi32, #tpu.memory_space<smem>>
      %c63_i32_57 = arith.constant 63 : i32
      %114 = arith.minsi %113, %c63_i32_57 : i32
      %c0_i32_58 = arith.constant 0 : i32
      %115 = arith.maxsi %114, %c0_i32_58 : i32
      %c0_i32_59 = arith.constant 0 : i32
      %116 = tpu.memref_slice %arg4[%115, %c0_i32_59] : memref<64x128xf32, #tpu.memory_space<any>> -> memref<1x128xf32, #tpu.memory_space<any>>
      %c5_i32_60 = arith.constant 5 : i32
      %c0_i32_61 = arith.constant 0 : i32
      %117 = tpu.memref_slice %arg10[%0, %c5_i32_60, %c0_i32_61] : memref<2x8x128xf32, #tpu.memory_space<vmem>> -> memref<1x1x128xf32, #tpu.memory_space<vmem>>
      %118 = tpu.memref_squeeze %117 : memref<1x1x128xf32, #tpu.memory_space<vmem>> -> memref<1x128xf32, #tpu.memory_space<vmem>>
      %119 = tpu.memref_slice %arg11[%0] : memref<2x!tpu.dma_semaphore, #tpu.memory_space<semaphore_mem>> -> memref<1x!tpu.dma_semaphore, #tpu.memory_space<semaphore_mem>>
      %120 = tpu.memref_squeeze %119 : memref<1x!tpu.dma_semaphore, #tpu.memory_space<semaphore_mem>> -> memref<!tpu.dma_semaphore, #tpu.memory_space<semaphore_mem>>
      tpu.enqueue_dma source(%116 : memref<1x128xf32, #tpu.memory_space<any>>) target(%118 : memref<1x128xf32, #tpu.memory_space<vmem>>) target_semaphore(%120 : memref<!tpu.dma_semaphore, #tpu.memory_space<semaphore_mem>>)
      %c6_i32 = arith.constant 6 : i32
      %121 = arith.addi %60, %c6_i32 : i32
      %122 = arith.index_cast %121 : i32 to index
      %123 = memref.load %arg2[%122] : memref<32xi32, #tpu.memory_space<smem>>
      %c63_i32_62 = arith.constant 63 : i32
      %124 = arith.minsi %123, %c63_i32_62 : i32
      %c0_i32_63 = arith.constant 0 : i32
      %125 = arith.maxsi %124, %c0_i32_63 : i32
      %c0_i32_64 = arith.constant 0 : i32
      %126 = tpu.memref_slice %arg4[%125, %c0_i32_64] : memref<64x128xf32, #tpu.memory_space<any>> -> memref<1x128xf32, #tpu.memory_space<any>>
      %c6_i32_65 = arith.constant 6 : i32
      %c0_i32_66 = arith.constant 0 : i32
      %127 = tpu.memref_slice %arg10[%0, %c6_i32_65, %c0_i32_66] : memref<2x8x128xf32, #tpu.memory_space<vmem>> -> memref<1x1x128xf32, #tpu.memory_space<vmem>>
      %128 = tpu.memref_squeeze %127 : memref<1x1x128xf32, #tpu.memory_space<vmem>> -> memref<1x128xf32, #tpu.memory_space<vmem>>
      %129 = tpu.memref_slice %arg11[%0] : memref<2x!tpu.dma_semaphore, #tpu.memory_space<semaphore_mem>> -> memref<1x!tpu.dma_semaphore, #tpu.memory_space<semaphore_mem>>
      %130 = tpu.memref_squeeze %129 : memref<1x!tpu.dma_semaphore, #tpu.memory_space<semaphore_mem>> -> memref<!tpu.dma_semaphore, #tpu.memory_space<semaphore_mem>>
      tpu.enqueue_dma source(%126 : memref<1x128xf32, #tpu.memory_space<any>>) target(%128 : memref<1x128xf32, #tpu.memory_space<vmem>>) target_semaphore(%130 : memref<!tpu.dma_semaphore, #tpu.memory_space<semaphore_mem>>)
      %c7_i32 = arith.constant 7 : i32
      %131 = arith.addi %60, %c7_i32 : i32
      %132 = arith.index_cast %131 : i32 to index
      %133 = memref.load %arg2[%132] : memref<32xi32, #tpu.memory_space<smem>>
      %c63_i32_67 = arith.constant 63 : i32
      %134 = arith.minsi %133, %c63_i32_67 : i32
      %c0_i32_68 = arith.constant 0 : i32
      %135 = arith.maxsi %134, %c0_i32_68 : i32
      %c0_i32_69 = arith.constant 0 : i32
      %136 = tpu.memref_slice %arg4[%135, %c0_i32_69] : memref<64x128xf32, #tpu.memory_space<any>> -> memref<1x128xf32, #tpu.memory_space<any>>
      %c7_i32_70 = arith.constant 7 : i32
      %c0_i32_71 = arith.constant 0 : i32
      %137 = tpu.memref_slice %arg10[%0, %c7_i32_70, %c0_i32_71] : memref<2x8x128xf32, #tpu.memory_space<vmem>> -> memref<1x1x128xf32, #tpu.memory_space<vmem>>
      %138 = tpu.memref_squeeze %137 : memref<1x1x128xf32, #tpu.memory_space<vmem>> -> memref<1x128xf32, #tpu.memory_space<vmem>>
      %139 = tpu.memref_slice %arg11[%0] : memref<2x!tpu.dma_semaphore, #tpu.memory_space<semaphore_mem>> -> memref<1x!tpu.dma_semaphore, #tpu.memory_space<semaphore_mem>>
      %140 = tpu.memref_squeeze %139 : memref<1x!tpu.dma_semaphore, #tpu.memory_space<semaphore_mem>> -> memref<!tpu.dma_semaphore, #tpu.memory_space<semaphore_mem>>
      tpu.enqueue_dma source(%136 : memref<1x128xf32, #tpu.memory_space<any>>) target(%138 : memref<1x128xf32, #tpu.memory_space<vmem>>) target_semaphore(%140 : memref<!tpu.dma_semaphore, #tpu.memory_space<semaphore_mem>>)
    } else {
    }
    %c1_i32_1 = arith.constant 1 : i32
    %5 = arith.addi %arg1, %c1_i32_1 : i32
    %c2_i32_2 = arith.constant 2 : i32
    %6 = arith.cmpi slt, %5, %c2_i32_2 : i32
    %7 = arith.extui %6 : i1 to i32
    %c0_i32_3 = arith.constant 0 : i32
    %8 = arith.cmpi ne, %7, %c0_i32_3 : i32
    scf.if %8 {
      %c16_i32 = arith.constant 16 : i32
      %60 = arith.muli %arg0, %c16_i32 : i32
      %c1_i32_30 = arith.constant 1 : i32
      %61 = arith.addi %arg1, %c1_i32_30 : i32
      %c8_i32 = arith.constant 8 : i32
      %62 = arith.muli %61, %c8_i32 : i32
      %63 = arith.addi %60, %62 : i32
      %c0_i32_31 = arith.constant 0 : i32
      %64 = arith.addi %63, %c0_i32_31 : i32
      %65 = arith.index_cast %64 : i32 to index
      %66 = memref.load %arg2[%65] : memref<32xi32, #tpu.memory_space<smem>>
      %c63_i32 = arith.constant 63 : i32
      %67 = arith.minsi %66, %c63_i32 : i32
      %c0_i32_32 = arith.constant 0 : i32
      %68 = arith.maxsi %67, %c0_i32_32 : i32
      %c0_i32_33 = arith.constant 0 : i32
      %69 = tpu.memref_slice %arg4[%68, %c0_i32_33] : memref<64x128xf32, #tpu.memory_space<any>> -> memref<1x128xf32, #tpu.memory_space<any>>
      %c0_i32_34 = arith.constant 0 : i32
      %c0_i32_35 = arith.constant 0 : i32
      %70 = tpu.memref_slice %arg10[%1, %c0_i32_34, %c0_i32_35] : memref<2x8x128xf32, #tpu.memory_space<vmem>> -> memref<1x1x128xf32, #tpu.memory_space<vmem>>
      %71 = tpu.memref_squeeze %70 : memref<1x1x128xf32, #tpu.memory_space<vmem>> -> memref<1x128xf32, #tpu.memory_space<vmem>>
      %72 = tpu.memref_slice %arg11[%1] : memref<2x!tpu.dma_semaphore, #tpu.memory_space<semaphore_mem>> -> memref<1x!tpu.dma_semaphore, #tpu.memory_space<semaphore_mem>>
      %73 = tpu.memref_squeeze %72 : memref<1x!tpu.dma_semaphore, #tpu.memory_space<semaphore_mem>> -> memref<!tpu.dma_semaphore, #tpu.memory_space<semaphore_mem>>
      tpu.enqueue_dma source(%69 : memref<1x128xf32, #tpu.memory_space<any>>) target(%71 : memref<1x128xf32, #tpu.memory_space<vmem>>) target_semaphore(%73 : memref<!tpu.dma_semaphore, #tpu.memory_space<semaphore_mem>>)
      %c1_i32_36 = arith.constant 1 : i32
      %74 = arith.addi %63, %c1_i32_36 : i32
      %75 = arith.index_cast %74 : i32 to index
      %76 = memref.load %arg2[%75] : memref<32xi32, #tpu.memory_space<smem>>
      %c63_i32_37 = arith.constant 63 : i32
      %77 = arith.minsi %76, %c63_i32_37 : i32
      %c0_i32_38 = arith.constant 0 : i32
      %78 = arith.maxsi %77, %c0_i32_38 : i32
      %c0_i32_39 = arith.constant 0 : i32
      %79 = tpu.memref_slice %arg4[%78, %c0_i32_39] : memref<64x128xf32, #tpu.memory_space<any>> -> memref<1x128xf32, #tpu.memory_space<any>>
      %c1_i32_40 = arith.constant 1 : i32
      %c0_i32_41 = arith.constant 0 : i32
      %80 = tpu.memref_slice %arg10[%1, %c1_i32_40, %c0_i32_41] : memref<2x8x128xf32, #tpu.memory_space<vmem>> -> memref<1x1x128xf32, #tpu.memory_space<vmem>>
      %81 = tpu.memref_squeeze %80 : memref<1x1x128xf32, #tpu.memory_space<vmem>> -> memref<1x128xf32, #tpu.memory_space<vmem>>
      %82 = tpu.memref_slice %arg11[%1] : memref<2x!tpu.dma_semaphore, #tpu.memory_space<semaphore_mem>> -> memref<1x!tpu.dma_semaphore, #tpu.memory_space<semaphore_mem>>
      %83 = tpu.memref_squeeze %82 : memref<1x!tpu.dma_semaphore, #tpu.memory_space<semaphore_mem>> -> memref<!tpu.dma_semaphore, #tpu.memory_space<semaphore_mem>>
      tpu.enqueue_dma source(%79 : memref<1x128xf32, #tpu.memory_space<any>>) target(%81 : memref<1x128xf32, #tpu.memory_space<vmem>>) target_semaphore(%83 : memref<!tpu.dma_semaphore, #tpu.memory_space<semaphore_mem>>)
      %c2_i32_42 = arith.constant 2 : i32
      %84 = arith.addi %63, %c2_i32_42 : i32
      %85 = arith.index_cast %84 : i32 to index
      %86 = memref.load %arg2[%85] : memref<32xi32, #tpu.memory_space<smem>>
      %c63_i32_43 = arith.constant 63 : i32
      %87 = arith.minsi %86, %c63_i32_43 : i32
      %c0_i32_44 = arith.constant 0 : i32
      %88 = arith.maxsi %87, %c0_i32_44 : i32
      %c0_i32_45 = arith.constant 0 : i32
      %89 = tpu.memref_slice %arg4[%88, %c0_i32_45] : memref<64x128xf32, #tpu.memory_space<any>> -> memref<1x128xf32, #tpu.memory_space<any>>
      %c2_i32_46 = arith.constant 2 : i32
      %c0_i32_47 = arith.constant 0 : i32
      %90 = tpu.memref_slice %arg10[%1, %c2_i32_46, %c0_i32_47] : memref<2x8x128xf32, #tpu.memory_space<vmem>> -> memref<1x1x128xf32, #tpu.memory_space<vmem>>
      %91 = tpu.memref_squeeze %90 : memref<1x1x128xf32, #tpu.memory_space<vmem>> -> memref<1x128xf32, #tpu.memory_space<vmem>>
      %92 = tpu.memref_slice %arg11[%1] : memref<2x!tpu.dma_semaphore, #tpu.memory_space<semaphore_mem>> -> memref<1x!tpu.dma_semaphore, #tpu.memory_space<semaphore_mem>>
      %93 = tpu.memref_squeeze %92 : memref<1x!tpu.dma_semaphore, #tpu.memory_space<semaphore_mem>> -> memref<!tpu.dma_semaphore, #tpu.memory_space<semaphore_mem>>
      tpu.enqueue_dma source(%89 : memref<1x128xf32, #tpu.memory_space<any>>) target(%91 : memref<1x128xf32, #tpu.memory_space<vmem>>) target_semaphore(%93 : memref<!tpu.dma_semaphore, #tpu.memory_space<semaphore_mem>>)
      %c3_i32 = arith.constant 3 : i32
      %94 = arith.addi %63, %c3_i32 : i32
      %95 = arith.index_cast %94 : i32 to index
      %96 = memref.load %arg2[%95] : memref<32xi32, #tpu.memory_space<smem>>
      %c63_i32_48 = arith.constant 63 : i32
      %97 = arith.minsi %96, %c63_i32_48 : i32
      %c0_i32_49 = arith.constant 0 : i32
      %98 = arith.maxsi %97, %c0_i32_49 : i32
      %c0_i32_50 = arith.constant 0 : i32
      %99 = tpu.memref_slice %arg4[%98, %c0_i32_50] : memref<64x128xf32, #tpu.memory_space<any>> -> memref<1x128xf32, #tpu.memory_space<any>>
      %c3_i32_51 = arith.constant 3 : i32
      %c0_i32_52 = arith.constant 0 : i32
      %100 = tpu.memref_slice %arg10[%1, %c3_i32_51, %c0_i32_52] : memref<2x8x128xf32, #tpu.memory_space<vmem>> -> memref<1x1x128xf32, #tpu.memory_space<vmem>>
      %101 = tpu.memref_squeeze %100 : memref<1x1x128xf32, #tpu.memory_space<vmem>> -> memref<1x128xf32, #tpu.memory_space<vmem>>
      %102 = tpu.memref_slice %arg11[%1] : memref<2x!tpu.dma_semaphore, #tpu.memory_space<semaphore_mem>> -> memref<1x!tpu.dma_semaphore, #tpu.memory_space<semaphore_mem>>
      %103 = tpu.memref_squeeze %102 : memref<1x!tpu.dma_semaphore, #tpu.memory_space<semaphore_mem>> -> memref<!tpu.dma_semaphore, #tpu.memory_space<semaphore_mem>>
      tpu.enqueue_dma source(%99 : memref<1x128xf32, #tpu.memory_space<any>>) target(%101 : memref<1x128xf32, #tpu.memory_space<vmem>>) target_semaphore(%103 : memref<!tpu.dma_semaphore, #tpu.memory_space<semaphore_mem>>)
      %c4_i32 = arith.constant 4 : i32
      %104 = arith.addi %63, %c4_i32 : i32
      %105 = arith.index_cast %104 : i32 to index
      %106 = memref.load %arg2[%105] : memref<32xi32, #tpu.memory_space<smem>>
      %c63_i32_53 = arith.constant 63 : i32
      %107 = arith.minsi %106, %c63_i32_53 : i32
      %c0_i32_54 = arith.constant 0 : i32
      %108 = arith.maxsi %107, %c0_i32_54 : i32
      %c0_i32_55 = arith.constant 0 : i32
      %109 = tpu.memref_slice %arg4[%108, %c0_i32_55] : memref<64x128xf32, #tpu.memory_space<any>> -> memref<1x128xf32, #tpu.memory_space<any>>
      %c4_i32_56 = arith.constant 4 : i32
      %c0_i32_57 = arith.constant 0 : i32
      %110 = tpu.memref_slice %arg10[%1, %c4_i32_56, %c0_i32_57] : memref<2x8x128xf32, #tpu.memory_space<vmem>> -> memref<1x1x128xf32, #tpu.memory_space<vmem>>
      %111 = tpu.memref_squeeze %110 : memref<1x1x128xf32, #tpu.memory_space<vmem>> -> memref<1x128xf32, #tpu.memory_space<vmem>>
      %112 = tpu.memref_slice %arg11[%1] : memref<2x!tpu.dma_semaphore, #tpu.memory_space<semaphore_mem>> -> memref<1x!tpu.dma_semaphore, #tpu.memory_space<semaphore_mem>>
      %113 = tpu.memref_squeeze %112 : memref<1x!tpu.dma_semaphore, #tpu.memory_space<semaphore_mem>> -> memref<!tpu.dma_semaphore, #tpu.memory_space<semaphore_mem>>
      tpu.enqueue_dma source(%109 : memref<1x128xf32, #tpu.memory_space<any>>) target(%111 : memref<1x128xf32, #tpu.memory_space<vmem>>) target_semaphore(%113 : memref<!tpu.dma_semaphore, #tpu.memory_space<semaphore_mem>>)
      %c5_i32 = arith.constant 5 : i32
      %114 = arith.addi %63, %c5_i32 : i32
      %115 = arith.index_cast %114 : i32 to index
      %116 = memref.load %arg2[%115] : memref<32xi32, #tpu.memory_space<smem>>
      %c63_i32_58 = arith.constant 63 : i32
      %117 = arith.minsi %116, %c63_i32_58 : i32
      %c0_i32_59 = arith.constant 0 : i32
      %118 = arith.maxsi %117, %c0_i32_59 : i32
      %c0_i32_60 = arith.constant 0 : i32
      %119 = tpu.memref_slice %arg4[%118, %c0_i32_60] : memref<64x128xf32, #tpu.memory_space<any>> -> memref<1x128xf32, #tpu.memory_space<any>>
      %c5_i32_61 = arith.constant 5 : i32
      %c0_i32_62 = arith.constant 0 : i32
      %120 = tpu.memref_slice %arg10[%1, %c5_i32_61, %c0_i32_62] : memref<2x8x128xf32, #tpu.memory_space<vmem>> -> memref<1x1x128xf32, #tpu.memory_space<vmem>>
      %121 = tpu.memref_squeeze %120 : memref<1x1x128xf32, #tpu.memory_space<vmem>> -> memref<1x128xf32, #tpu.memory_space<vmem>>
      %122 = tpu.memref_slice %arg11[%1] : memref<2x!tpu.dma_semaphore, #tpu.memory_space<semaphore_mem>> -> memref<1x!tpu.dma_semaphore, #tpu.memory_space<semaphore_mem>>
      %123 = tpu.memref_squeeze %122 : memref<1x!tpu.dma_semaphore, #tpu.memory_space<semaphore_mem>> -> memref<!tpu.dma_semaphore, #tpu.memory_space<semaphore_mem>>
      tpu.enqueue_dma source(%119 : memref<1x128xf32, #tpu.memory_space<any>>) target(%121 : memref<1x128xf32, #tpu.memory_space<vmem>>) target_semaphore(%123 : memref<!tpu.dma_semaphore, #tpu.memory_space<semaphore_mem>>)
      %c6_i32 = arith.constant 6 : i32
      %124 = arith.addi %63, %c6_i32 : i32
      %125 = arith.index_cast %124 : i32 to index
      %126 = memref.load %arg2[%125] : memref<32xi32, #tpu.memory_space<smem>>
      %c63_i32_63 = arith.constant 63 : i32
      %127 = arith.minsi %126, %c63_i32_63 : i32
      %c0_i32_64 = arith.constant 0 : i32
      %128 = arith.maxsi %127, %c0_i32_64 : i32
      %c0_i32_65 = arith.constant 0 : i32
      %129 = tpu.memref_slice %arg4[%128, %c0_i32_65] : memref<64x128xf32, #tpu.memory_space<any>> -> memref<1x128xf32, #tpu.memory_space<any>>
      %c6_i32_66 = arith.constant 6 : i32
      %c0_i32_67 = arith.constant 0 : i32
      %130 = tpu.memref_slice %arg10[%1, %c6_i32_66, %c0_i32_67] : memref<2x8x128xf32, #tpu.memory_space<vmem>> -> memref<1x1x128xf32, #tpu.memory_space<vmem>>
      %131 = tpu.memref_squeeze %130 : memref<1x1x128xf32, #tpu.memory_space<vmem>> -> memref<1x128xf32, #tpu.memory_space<vmem>>
      %132 = tpu.memref_slice %arg11[%1] : memref<2x!tpu.dma_semaphore, #tpu.memory_space<semaphore_mem>> -> memref<1x!tpu.dma_semaphore, #tpu.memory_space<semaphore_mem>>
      %133 = tpu.memref_squeeze %132 : memref<1x!tpu.dma_semaphore, #tpu.memory_space<semaphore_mem>> -> memref<!tpu.dma_semaphore, #tpu.memory_space<semaphore_mem>>
      tpu.enqueue_dma source(%129 : memref<1x128xf32, #tpu.memory_space<any>>) target(%131 : memref<1x128xf32, #tpu.memory_space<vmem>>) target_semaphore(%133 : memref<!tpu.dma_semaphore, #tpu.memory_space<semaphore_mem>>)
      %c7_i32 = arith.constant 7 : i32
      %134 = arith.addi %63, %c7_i32 : i32
      %135 = arith.index_cast %134 : i32 to index
      %136 = memref.load %arg2[%135] : memref<32xi32, #tpu.memory_space<smem>>
      %c63_i32_68 = arith.constant 63 : i32
      %137 = arith.minsi %136, %c63_i32_68 : i32
      %c0_i32_69 = arith.constant 0 : i32
      %138 = arith.maxsi %137, %c0_i32_69 : i32
      %c0_i32_70 = arith.constant 0 : i32
      %139 = tpu.memref_slice %arg4[%138, %c0_i32_70] : memref<64x128xf32, #tpu.memory_space<any>> -> memref<1x128xf32, #tpu.memory_space<any>>
      %c7_i32_71 = arith.constant 7 : i32
      %c0_i32_72 = arith.constant 0 : i32
      %140 = tpu.memref_slice %arg10[%1, %c7_i32_71, %c0_i32_72] : memref<2x8x128xf32, #tpu.memory_space<vmem>> -> memref<1x1x128xf32, #tpu.memory_space<vmem>>
      %141 = tpu.memref_squeeze %140 : memref<1x1x128xf32, #tpu.memory_space<vmem>> -> memref<1x128xf32, #tpu.memory_space<vmem>>
      %142 = tpu.memref_slice %arg11[%1] : memref<2x!tpu.dma_semaphore, #tpu.memory_space<semaphore_mem>> -> memref<1x!tpu.dma_semaphore, #tpu.memory_space<semaphore_mem>>
      %143 = tpu.memref_squeeze %142 : memref<1x!tpu.dma_semaphore, #tpu.memory_space<semaphore_mem>> -> memref<!tpu.dma_semaphore, #tpu.memory_space<semaphore_mem>>
      tpu.enqueue_dma source(%139 : memref<1x128xf32, #tpu.memory_space<any>>) target(%141 : memref<1x128xf32, #tpu.memory_space<vmem>>) target_semaphore(%143 : memref<!tpu.dma_semaphore, #tpu.memory_space<semaphore_mem>>)
    } else {
    }
    %c0 = arith.constant 0 : index
    %c0_4 = arith.constant 0 : index
    %c0_5 = arith.constant 0 : index
    %9 = vector.load %arg3[%c0, %c0_4, %c0_5] : memref<1x8x1xi32, #tpu.memory_space<vmem>>, vector<1x8x1xi32>
    %10 = vector.shape_cast %9 : vector<1x8x1xi32> to vector<8x1xi32>
    %c1_i32_6 = arith.constant 1 : i32
    %11 = vector.broadcast %c1_i32_6 : i32 to vector<8x1xi32>
    %12 = arith.minsi %10, %11 : vector<8x1xi32>
    %c0_i32_7 = arith.constant 0 : i32
    %13 = vector.broadcast %c0_i32_7 : i32 to vector<8x1xi32>
    %14 = arith.maxsi %12, %13 : vector<8x1xi32>
    %15 = arith.sitofp %14 : vector<8x1xi32> to vector<8x1xf32>
    %c0_8 = arith.constant 0 : index
    %c0_9 = arith.constant 0 : index
    %16 = vector.load %arg6[%c0_8, %c0_9] : memref<2x128xf32, #tpu.memory_space<vmem>>, vector<1x128xf32>
    %c1 = arith.constant 1 : index
    %c0_10 = arith.constant 0 : index
    %17 = vector.load %arg6[%c1, %c0_10] : memref<2x128xf32, #tpu.memory_space<vmem>>, vector<1x128xf32>
    %c0_11 = arith.constant 0 : index
    %c0_12 = arith.constant 0 : index
    %18 = vector.load %arg5[%c0_11, %c0_12] : memref<8x128xf32, #tpu.memory_space<vmem>>, vector<8x128xf32>
    %19 = arith.subf %17, %16 : vector<1x128xf32>
    %20 = vector.broadcast %15 : vector<8x1xf32> to vector<8x128xf32>
    %21 = vector.broadcast %19 : vector<1x128xf32> to vector<8x128xf32>
    %22 = arith.mulf %20, %21 : vector<8x128xf32>
    %23 = vector.broadcast %16 : vector<1x128xf32> to vector<8x128xf32>
    %24 = arith.addf %23, %22 : vector<8x128xf32>
    %25 = arith.addf %18, %24 : vector<8x128xf32>
    %c0_i32_13 = arith.constant 0 : i32
    %c0_i32_14 = arith.constant 0 : i32
    %26 = tpu.memref_slice %arg4[%c0_i32_13, %c0_i32_14] : memref<64x128xf32, #tpu.memory_space<any>> -> memref<8x128xf32, #tpu.memory_space<any>>
    %c0_i32_15 = arith.constant 0 : i32
    %c0_i32_16 = arith.constant 0 : i32
    %27 = tpu.memref_slice %arg10[%0, %c0_i32_15, %c0_i32_16] : memref<2x8x128xf32, #tpu.memory_space<vmem>> -> memref<1x8x128xf32, #tpu.memory_space<vmem>>
    %28 = tpu.memref_squeeze %27 : memref<1x8x128xf32, #tpu.memory_space<vmem>> -> memref<8x128xf32, #tpu.memory_space<vmem>>
    %29 = tpu.memref_slice %arg11[%0] : memref<2x!tpu.dma_semaphore, #tpu.memory_space<semaphore_mem>> -> memref<1x!tpu.dma_semaphore, #tpu.memory_space<semaphore_mem>>
    %30 = tpu.memref_squeeze %29 : memref<1x!tpu.dma_semaphore, #tpu.memory_space<semaphore_mem>> -> memref<!tpu.dma_semaphore, #tpu.memory_space<semaphore_mem>>
    tpu.wait_dma2 semaphore(%30 : memref<!tpu.dma_semaphore, #tpu.memory_space<semaphore_mem>>) src(%26 : memref<8x128xf32, #tpu.memory_space<any>>) dst(%28 : memref<8x128xf32, #tpu.memory_space<vmem>>)
    %31 = arith.index_cast %0 : i32 to index
    %c0_17 = arith.constant 0 : index
    %c0_18 = arith.constant 0 : index
    %32 = vector.load %arg10[%31, %c0_17, %c0_18] : memref<2x8x128xf32, #tpu.memory_space<vmem>>, vector<1x8x128xf32>
    %33 = vector.shape_cast %32 : vector<1x8x128xf32> to vector<8x128xf32>
    %34 = arith.addf %33, %25 : vector<8x128xf32>
    %cst = arith.constant dense<0.000000e+00> : vector<8xf32>
    %35 = vector.multi_reduction <add>, %34, %cst [1] : vector<8x128xf32> to vector<8xf32>
    %36 = vector.shape_cast %35 : vector<8xf32> to vector<8x1xf32>
    %cst_19 = arith.constant 1.280000e+02 : f32
    %37 = vector.broadcast %cst_19 : f32 to vector<8x1xf32>
    %38 = arith.divf %36, %37 : vector<8x1xf32>
    %39 = vector.broadcast %38 : vector<8x1xf32> to vector<8x128xf32>
    %40 = arith.subf %34, %39 : vector<8x128xf32>
    %41 = arith.mulf %40, %40 : vector<8x128xf32>
    %cst_20 = arith.constant dense<0.000000e+00> : vector<8xf32>
    %42 = vector.multi_reduction <add>, %41, %cst_20 [1] : vector<8x128xf32> to vector<8xf32>
    %43 = vector.shape_cast %42 : vector<8xf32> to vector<8x1xf32>
    %cst_21 = arith.constant 1.280000e+02 : f32
    %44 = vector.broadcast %cst_21 : f32 to vector<8x1xf32>
    %45 = arith.divf %43, %44 : vector<8x1xf32>
    %cst_22 = arith.constant 9.99999996E-13 : f32
    %46 = vector.broadcast %cst_22 : f32 to vector<8x1xf32>
    %47 = arith.addf %45, %46 : vector<8x1xf32>
    %48 = math.rsqrt %47 : vector<8x1xf32>
    %49 = vector.broadcast %48 : vector<8x1xf32> to vector<8x128xf32>
    %50 = arith.mulf %40, %49 : vector<8x128xf32>
    %c0_23 = arith.constant 0 : index
    %c0_24 = arith.constant 0 : index
    %51 = vector.load %arg7[%c0_23, %c0_24] : memref<1x128xf32, #tpu.memory_space<vmem>>, vector<1x128xf32>
    %52 = vector.broadcast %51 : vector<1x128xf32> to vector<8x128xf32>
    %53 = arith.mulf %50, %52 : vector<8x128xf32>
    %c0_25 = arith.constant 0 : index
    %c0_26 = arith.constant 0 : index
    %54 = vector.load %arg8[%c0_25, %c0_26] : memref<1x128xf32, #tpu.memory_space<vmem>>, vector<1x128xf32>
    %55 = vector.broadcast %54 : vector<1x128xf32> to vector<8x128xf32>
    %56 = arith.addf %53, %55 : vector<8x128xf32>
    %c0_27 = arith.constant 0 : index
    %c0_28 = arith.constant 0 : index
    %c0_29 = arith.constant 0 : index
    %57 = vector.load %arg9[%c0_27, %c0_28, %c0_29] : memref<1x8x128xf32, #tpu.memory_space<vmem>>, vector<1x8x128xf32>
    %58 = vector.shape_cast %57 : vector<1x8x128xf32> to vector<8x128xf32>
    %59 = vector.shape_cast %56 : vector<8x128xf32> to vector<1x8x128xf32>
    tpu.vector_store %arg9[%c0_27, %c0_28, %c0_29], %59 {strides = array<i32>} : memref<1x8x128xf32, #tpu.memory_space<vmem>>, vector<1x8x128xf32>,
    return
  }
  func.func @transform_0(%arg0: i32, %arg1: i32, %arg2: memref<32xi32, #tpu.memory_space<smem>>) -> (i32, i32, i32) {
    %c0_i32 = arith.constant 0 : i32
    %c0_i32_0 = arith.constant 0 : i32
    return %arg0, %arg1, %c0_i32 : i32, i32, i32
  }
  func.func @transform_2(%arg0: i32, %arg1: i32, %arg2: memref<32xi32, #tpu.memory_space<smem>>) -> (i32, i32) {
    %c0_i32 = arith.constant 0 : i32
    %c0_i32_0 = arith.constant 0 : i32
    return %arg1, %c0_i32 : i32, i32
  }
  func.func @transform_3(%arg0: i32, %arg1: i32, %arg2: memref<32xi32, #tpu.memory_space<smem>>) -> (i32, i32) {
    %c0_i32 = arith.constant 0 : i32
    %c0_i32_0 = arith.constant 0 : i32
    %c0_i32_1 = arith.constant 0 : i32
    return %c0_i32, %c0_i32_0 : i32, i32
  }
  func.func @transform_4(%arg0: i32, %arg1: i32, %arg2: memref<32xi32, #tpu.memory_space<smem>>) -> (i32, i32) {
    %c0_i32 = arith.constant 0 : i32
    %c0_i32_0 = arith.constant 0 : i32
    %c0_i32_1 = arith.constant 0 : i32
    return %c0_i32, %c0_i32_0 : i32, i32
  }
  func.func @transform_5(%arg0: i32, %arg1: i32, %arg2: memref<32xi32, #tpu.memory_space<smem>>) -> (i32, i32) {
    %c0_i32 = arith.constant 0 : i32
    %c0_i32_0 = arith.constant 0 : i32
    %c0_i32_1 = arith.constant 0 : i32
    return %c0_i32, %c0_i32_0 : i32, i32
  }
  func.func @transform_6(%arg0: i32, %arg1: i32, %arg2: memref<32xi32, #tpu.memory_space<smem>>) -> (i32, i32, i32) {
    %c0_i32 = arith.constant 0 : i32
    %c0_i32_0 = arith.constant 0 : i32
    return %arg0, %arg1, %c0_i32 : i32, i32, i32
  }
}

</mosaic_0001>

<bundles_post_ra>
// kernel: tpu_custom_call.1
= control target key start
LH: loop header
LB: loop body
LE: loop exit
PB: predicated region body
PF: predicated region fallthrough
CT: control target
= control target key end

     0   :  { %s2590_s0 = inlined_call_operand.vmem [shape: s32[32], index: 0, kind: input, shape index: {}]   ;;  %s2591_s1 = inlined_call_operand.vmem [shape: s32[2,16,1], index: 1, kind: input, shape index: {}]   ;;  %s2592_s2 = inlined_call_operand.hbm [shape: f32[64,128], index: 2, kind: input, shape index: {}]   ;;  %s2593_s3 = inlined_call_operand.vmem [shape: f32[16,128], index: 3, kind: input, shape index: {}]   ;;  %s2594_s4 = inlined_call_operand.vmem [shape: f32[2,128], index: 4, kind: input, shape index: {}]   ;;  %s2595_s5 = inlined_call_operand.vmem [shape: f32[1,128], index: 5, kind: input, shape index: {}]   ;;  %s2596_s6 = inlined_call_operand.vmem [shape: f32[1,128], index: 6, kind: input, shape index: {}]   ;;  %s2597_s7 = inlined_call_operand.hbm [shape: f32[2,16,128], index: 7, kind: output, shape index: {}]  }
   0x1   :  { %2615 = sst [smem:[#allocation72_spill]] %s2591_s1  ;;  %s12_s26 = sshll.u32 %s2590_s0, 4  ;;  %s13_s26 = int_to_ptr.vmem [resolvable:$true] %s12_s26 }
   0x2   :  { %2616 = sst [smem:[#allocation73_spill]] %s2595_s5  ;;  %s1195_s27 = scalar_lea.vmem %s13_s26, 16 }
   0x3   :  { %2617 = sst [smem:[#allocation74_spill]] %s2596_s6  ;;  %p1196_p0 = scmp.ne.s32.totalorder %s13_s26, %s1195_s27 }
   0x4   :  { %2618 = sst [smem:[#allocation75_spill]] %s2597_s7  ;;  %p1200_p1 = scmp.lt.s32.totalorder %s13_s26, %s13_s26 }
   0x5   :  { %p1201_p2 = scmp.lt.s32.totalorder %s1195_s27, %s1195_s27 }
   0x7   :  { %p1202_p3 = por %p1201_p2, %p1200_p1 }
   0x9   :  { %p1203_p4 = pnand %p1202_p3, %p1196_p0 }
   0xb   :  { %1206 = shalt.err (!%p1203_p4)  }
   0xc   :  { %s1755_s28 = smov [#allocation5]  }
   0xd   :  { %15 = dma.vmem_to_smem %s13_s26, 16, %s1755_s28, [#allocation4] }
   0xe   :  { %1715 = dma.done.wait [#allocation4], 16 }
   0xf   :  { %1716 = vsyncadd [#allocation4], 4294967280 }
  0x10   :  { %17 = sfence }
  0x11   :  { %18 = vsyncpa [#allocation7], 0 }
  0x12   :  { %20 = vsyncpa [#allocation7 + $0x1], 0  ;;  %s1802_s29 = smov 0   ;;  %s1804_s30 = smov 0  }
  0x13   :  { %s1806_s0 = smov 0   ;;  %s1808_s8 = smov 0  }
  0x14   :  { %s1810_s9 = smov 0   ;;  %s1812_s10 = smov 0  }
  0x15   :  { %s1814_s11 = smov 0   ;;  %s1816_s12 = smov 0  }
  0x16 LB: > { %2619 = sst [smem:[#allocation61_spill]] %s1725_s29  ;;  %s894_s13 = sadd.s32 4294967295, %s1753_s12   ;;  %s1753_s12 = sphi %s1816_s12, %s26_s12   ;;  %s1749_s11 = sphi %s1814_s11, %s2663_s11   ;;  %s1745_s10 = sphi %s1812_s10, %s2662_s10   ;;  %s1741_s9 = sphi %s1810_s9, %s2661_s9   ;;  %s1737_s8 = sphi %s1808_s8, %s2660_s8   ;;  %s1733_s0 = sphi %s1806_s0, %s2659_s0   ;;  %s1729_s30 = sphi %s1804_s30, %s2658_s30   ;;  %s1725_s29 = sphi %s1802_s29, %s2657_s29  }
  0x17   : > { %2620 = sst [smem:[#allocation62_spill]] %s1729_s30  ;;  %s895_s14 = sadd.s32 4294967294, %s1753_s12  }
  0x18   : > { %2621 = sst [smem:[#allocation63_spill]] %s1733_s0  ;;  %s35_s15 = sadd.s32 1, %s1745_s10 }
  0x19   : > { %2622 = sst [smem:[#allocation64_spill]] %s1745_s10  ;;  %p36_p5 = scmp.ge.s32.totalorder %s35_s15, 2 }
  0x1a   : > { %2623 = sst [smem:[#allocation65_spill]] %s1749_s11  ;;  %s38_s16 = sadd.s32 1, %s1749_s11 }
  0x1b   : > { %2624 = sst [smem:[#allocation66_spill]] %s1753_s12  ;;  %p174_p6 = scmp.ne.s32.totalorder %s1733_s0, %s1729_s30 }
  0x1c   : > { %p175_p7 = scmp.eq.s32.totalorder %s894_s13, 3  ;;  %s2665_s15 = smov (%p36_p5, %s35_s15), 0 }
  0x1d   : > { %2625 = sst [smem:[#allocation67_spill]] %s2665_s15  ;;  %s2667_s16 = smov (!%p36_p5, %s38_s16), %s1749_s11 }
  0x1e   : > { %s160_s17 = ssub.s32 %s1745_s10, %s2665_s15  ;;  %p1853_p8 = por %p175_p7, %p174_p6 }
  0x1f   : > { %p40_p9 = scmp.ge.s32.totalorder %s2667_s16, 2  ;;  %p180_p10 = scmp.ne.s32.totalorder %s1729_s30, %s1725_s29 }
  0x20   : > { %s2626_s18 = scalar_select %p1853_p8, 1, 0 }
  0x21   : > { %p181_p11 = scmp.eq.s32.totalorder %s895_s14, 3  ;;  %p898_p12 = scmp.ge.s32.totalorder %s1753_s12, 1 }
  0x22   : > { %2627 = sst [smem:[#allocation68_spill]] %s2626_s18  ;;  %s2669_s16 = smov (%p40_p9, %s2667_s16), 0 }
  0x23   : > { %2628 = sst [smem:[#allocation69_spill]] %s2669_s16  ;;  %p1862_p13 = por %p181_p11, %p180_p10 }
  0x24   : > { %p226_p0 = scmp.lt.s32.totalorder %s1753_s12, 5  ;;  %s159_s20 = ssub.s32 %s1749_s11, %s2669_s16 }
  0x25   : > { %s2629_s19 = scalar_select %p1862_p13, 1, 0 }
  0x26   : > { %s164_s21 = sadd.s32 1, %s1733_s0  ;;  %s161_s22 = sor.u32 %s160_s17, %s159_s20 }
  0x27   : > { %2630 = sst [smem:[#allocation70_spill]] %s2629_s19  ;;  %p227_p1 = pnand %p898_p12, %p226_p0 }
  0x28   : > { %p162_p2 = scmp.eq.s32.totalorder %s161_s22, 0  ;;  %p261_p3 = scmp.lt.s32.totalorder (!%p227_p1), %s1741_s9, 1  ;;  %v1756_v0 = vmov (!%p227_p1), 0  }
  0x29   : > { %230 = sbr.rel (%p227_p1) target bundleno = 851 (0x353), region = 40  ;;  %p263_p4 = scmp.lt.s32.totalorder (!%p227_p1), %s1737_s8, 1  ;;  %1192 = vset.pattern.permute.xlu0 (!%p227_p1), %v1756_v0 }
  0x2a   : > { %s1871_s23 = scalar_select %p162_p2, %s1733_s0, %s164_s21  }
  0x2b   : > { %s2601_s24 = sand.u32 (!%p227_p1), 1, %s1729_s30   ;;  %p273_p5 = scmp.lt.s32.totalorder (!%p227_p1), %s1737_s8, 0 }
  0x2c   : > { %2631 = sst [smem:[#allocation71_spill]] %s1871_s23  ;;  %s1883_s28 = sshll.u32 (!%p227_p1), %s2601_s24, 3 }
  0x2d   : > { %s274_s17 = ssub.s32 (!%p227_p1), 0, %s1737_s8  ;;  %s2632_s1 = sld [smem:[#allocation72_spill]] (!%p227_p1) }
  0x2e   : > { %s903_s16 = smin.u32 (!%p227_p1), %s1737_s8, %s274_s17  ;;  %p1123_p6 = scmp.eq.s32.totalorder (!%p227_p1), %s1737_s8, 0 }
  0x2f   : > { %s276_s15 = sand.u32 (!%p227_p1), 1, %s903_s16   ;;  %s1946_s10 = scalar_lea.hbm (!%p227_p1), %s2592_s2, 1024 }
  0x30   : > { %s262_s25 = scalar_select %p261_p3, %s1741_s9, 1 }
  0x31   : > { %s1879_s26 = scalar_select %p263_p4, %s1737_s8, 1 }
  0x32   : > { %s900_s27 = sshll.u32 %s262_s25, 1  ;;  %s277_s11 = ssub.s32 0, %s276_s15 }
  0x33   : > { %s266_s13 = sadd.s32 %s900_s27, %s1879_s26  ;;  %s2671_s11 = smov (!%p273_p5, %s277_s11), %s276_s15 }
  0x34   : > { %s901_s14 = sshll.u32 %s266_s13, 3  ;;  %s1897_s25 = sshll.u32 %s1741_s9, 4 }
  0x35   : > { %s268_s22 = scalar_lea.vmem %s2632_s1, %s901_s14  ;;  %s912_s13 = sshll.u32 %s2671_s11, 3 }
  0x36   : > { %v629_v1 = vld [vmem:[%s268_s22] sm:$0xff]  ;;  %s1068_s27 = scalar_select %p1123_p6, [#allocation5], [#allocation42] }
  0x37   : > { %vm630_vm0 = vcmp.lt.s32.totalorder %v629_v1, 1  ;;  %s1069_s16 = scalar_select %p1123_p6, %s1897_s25, 0 }
  0x38   : > { %v631_v2 = vsel %vm630_vm0, %v629_v1, 1  ;;  %s306_s15 = sadd.s32 1, %s1897_s25  ;;  %s1906_s17 = scalar_lea.vmem [#allocation2], %s912_s13 }
  0x39   : > { %vm632_vm1 = vcmp.gt.s32.totalorder %v631_v2, 0  ;;  %v1021_v3 = vcvt.s32.f32 %v631_v2  ;;  %s285_s14 = sld [smem:[%s1068_s27 + %s1069_s16]]  ;;  %s302_s20 = sshll.u32 %s1906_s17, 4  ;;  %s1914_s20 = int_to_ptr.vmem [resolvable:$true] %s302_s20 }
  0x3a   : > { %s772_s21 = scalar_lea.vmem %s1906_s17, 1 [#allocation2]  ;;  %s2673_s15 = smov (!%p1123_p6, %s306_s15), 0 }
  0x3b   : > { %v1022_v4 = vsel %vm632_vm1, %v1021_v3, 0.0  ;;  %s1071_s22 = scalar_select %p1123_p6, [#allocation5], [#allocation43] }
  0x3c   : > { %641 = vperm.xlu0 %1192, %v1022_v4   ;;  %s1916_s24 = sshll.u32 %s772_s21, 4  ;;  %s327_s16 = sadd.s32 2, %s1897_s25  ;;  %s1980_s24 = int_to_ptr.vmem [resolvable:$true] %s1916_s24 }
  0x3d   : > { %s1918_s27 = sld [smem:[%s1071_s22 + %s2673_s15]]  ;;  %s2679_s16 = smov (!%p1123_p6, %s327_s16), 0 }
  0x3e   : > { %s1923_s13 = scalar_select %p1123_p6, [#allocation5], [#allocation44] }
  0x3f   : > { %p286_p7 = scmp.lt.s32.totalorder %s285_s14, 63  ;;  %p906_p9 = scmp.gt.s32.totalorder %s285_s14, 0 }
  0x40   : > { %s1937_s15 = scalar_lea.sflag [#allocation3], %s2671_s11 }
  0x41   : > { %s2675_s14 = smov (!%p286_p7, %s285_s14), 63 }
  0x42   : > { %s2677_s14 = smov (!%p906_p9, %s2675_s14), 0 }
  0x43   : > { %s911_s1 = sshll.u32 %s2677_s14, 4  ;;  %p308_p10 = scmp.lt.s32.totalorder %s1918_s27, 63 }
  0x44   : > { %s1933_s0 = scalar_lea.hbm %s2592_s2, %s911_s1 }
  0x45   : > { %s1207_s22 = scalar_lea.hbm %s1933_s0, 16  ;;  %p1212_p1 = scmp.lt.u32.totalorder %s1933_s0, %s2592_s2 }
  0x46   : > { %p1208_p11 = scmp.ne.s32.totalorder %s1933_s0, %s1207_s22  ;;  %p1213_p2 = scmp.lt.u32.totalorder %s1946_s10, %s1207_s22 }
  0x47   : > { %p1215_p4 = scmp.lt.u32.totalorder %s1207_s22, %s1933_s0 }
  0x48   : > { %p1209_p12 = pnand %p1208_p11, %p1123_p6  ;;  %p1214_p3 = por %p1213_p2, %p1212_p1 }
  0x4a   : > { %p1210_p0 = pneg %p1209_p12  ;;  %p1216_p5 = por %p1215_p4, %p1214_p3 }
  0x4c   : > { %p1217_p7 = pnand %p1216_p5, %p1210_p0 }
  0x4e   : > { %1220 = shalt.err (!%p1217_p7)  }
  0x4f   : > { %s1221_s21 = scalar_lea.vmem %s1914_s20, 16  ;;  %s1757_s19 = smov [#allocation2]  }
  0x50   : > { %p1222_p9 = scmp.ne.s32.totalorder %s1914_s20, %s1221_s21  ;;  %s1225_s14 = sshll.u32 %s1757_s19, 4  ;;  %s1958_s14 = int_to_ptr.vmem [resolvable:$false] %s1225_s14 }
  0x51   : > { %s1961_s23 = scalar_lea.vmem %s1958_s14, 256  ;;  %p1228_p0 = scmp.lt.s32.totalorder %s1914_s20, %s1958_s14 }
  0x52   : > { %p1223_p11 = pnand %p1222_p9, %p1123_p6  ;;  %p1229_p1 = scmp.lt.s32.totalorder %s1961_s23, %s1221_s21 }
  0x54   : > { %p1224_p12 = pneg %p1223_p11  ;;  %p1230_p2 = por %p1229_p1, %p1228_p0 }
  0x56   : > { %p1231_p3 = pnand %p1230_p2, %p1224_p12 }
  0x58   : > { %1234 = shalt.err (!%p1231_p3)  }
  0x59   : > { %1070 = dma.hbm_to_vmem [thread:$0]  (%p1123_p6), %s1933_s0, 16, %s1914_s20, %s1937_s15 }
  0x5a   : > { %s309_s22 = scalar_select %p308_p10, %s1918_s27, 63 }
  0x5b   : > { %p913_p4 = scmp.gt.s32.totalorder %s1918_s27, 0  ;;  %s1977_s1 = sld [smem:[%s1923_s13 + %s2679_s16]] }
  0x5c   : > { %s2633_s21 = scalar_lea.vmem %s1906_s17, 2 [#allocation2]  ;;  %s348_s29 = sadd.s32 3, %s1897_s25 }
  0x5d   : > { %s344_s19 = sshll.u32 %s2633_s21, 4  ;;  %s2681_s22 = smov (!%p913_p4, %s309_s22), 0  ;;  %s1986_s19 = int_to_ptr.vmem [resolvable:$true] %s344_s19 }
  0x5e   : > { %s782_s12 = scalar_lea.vmem %s1906_s17, 3 [#allocation2]  ;;  %s918_s7 = sshll.u32 %s2681_s22, 4 }
  0x5f   : > { %s313_s0 = scalar_lea.hbm %s2592_s2, %s918_s7  ;;  %s1991_s20 = sshll.u32 %s782_s12, 4  ;;  %s2056_s20 = int_to_ptr.vmem [resolvable:$true] %s1991_s20 }
  0x60   : > { %s1235_s27 = scalar_lea.hbm %s313_s0, 16  ;;  %p1240_p9 = scmp.lt.u32.totalorder %s313_s0, %s2592_s2 }
  0x61   : > { %p1236_p10 = scmp.ne.s32.totalorder %s313_s0, %s1235_s27  ;;  %p1241_p11 = scmp.lt.u32.totalorder %s1946_s10, %s1235_s27 }
  0x62   : > { %p1243_p0 = scmp.lt.u32.totalorder %s1235_s27, %s313_s0 }
  0x63   : > { %p1237_p5 = pnand %p1236_p10, %p1123_p6  ;;  %p1242_p12 = por %p1241_p11, %p1240_p9 }
  0x65   : > { %p1238_p7 = pneg %p1237_p5  ;;  %p1244_p1 = por %p1243_p0, %p1242_p12 }
  0x67   : > { %p1245_p2 = pnand %p1244_p1, %p1238_p7 }
  0x69   : > { %1248 = shalt.err (!%p1245_p2)  }
  0x6a   : > { %s1249_s5 = scalar_lea.vmem %s1980_s24, 16  ;;  %p1256_p5 = scmp.lt.s32.totalorder %s1980_s24, %s1958_s14 }
  0x6b   : > { %p1250_p3 = scmp.ne.s32.totalorder %s1980_s24, %s1249_s5  ;;  %p1257_p13 = scmp.lt.s32.totalorder %s1961_s23, %s1249_s5 }
  0x6d   : > { %p1251_p4 = pnand %p1250_p3, %p1123_p6  ;;  %p1258_p8 = por %p1257_p13, %p1256_p5 }
  0x6f   : > { %p1252_p10 = pneg %p1251_p4 }
  0x71   : > { %p1259_p9 = pnand %p1258_p8, %p1252_p10 }
  0x73   : > { %1262 = shalt.err (!%p1259_p9)  }
  0x74   : > { %1073 = dma.hbm_to_vmem [thread:$0]  (%p1123_p6), %s313_s0, 16, %s1980_s24, %s1937_s15 }
  0x75   : > { %p329_p7 = scmp.lt.s32.totalorder %s1977_s1, 63  ;;  %p920_p11 = scmp.gt.s32.totalorder %s1977_s1, 0 }
  0x76   : > { %s1077_s6 = scalar_select %p1123_p6, [#allocation5], [#allocation45] }
  0x77   : > { %s2683_s1 = smov (!%p329_p7, %s1977_s1), 63  ;;  %s2685_s29 = smov (!%p1123_p6, %s348_s29), 0 }
  0x78   : > { %s2687_s1 = smov (!%p920_p11, %s2683_s1), 0  ;;  %s2019_s7 = sld [smem:[%s1077_s6 + %s2685_s29]] }
  0x79   : > { %s369_s12 = sadd.s32 4, %s1897_s25  ;;  %s925_s22 = sshll.u32 %s2687_s1, 4 }
  0x7a   : > { %s787_s21 = scalar_lea.vmem %s1906_s17, 4 [#allocation2]  ;;  %s334_s13 = scalar_lea.hbm %s2592_s2, %s925_s22 }
  0x7b   : > { %s2026_s24 = sshll.u32 %s787_s21, 4  ;;  %s1263_s0 = scalar_lea.hbm %s334_s13, 16  ;;  %s2059_s24 = int_to_ptr.vmem [resolvable:$true] %s2026_s24 }
  0x7c   : > { %p1264_p8 = scmp.ne.s32.totalorder %s334_s13, %s1263_s0  ;;  %p1268_p0 = scmp.lt.u32.totalorder %s334_s13, %s2592_s2 }
  0x7d   : > { %p1269_p1 = scmp.lt.u32.totalorder %s1946_s10, %s1263_s0  ;;  %p1271_p3 = scmp.lt.u32.totalorder %s1263_s0, %s334_s13 }
  0x7e   : > { %p1265_p13 = pnand %p1264_p8, %p1123_p6 }
  0x7f   : > { %p1270_p2 = por %p1269_p1, %p1268_p0 }
  0x80   : > { %p1266_p12 = pneg %p1265_p13 }
  0x81   : > { %p1272_p4 = por %p1271_p3, %p1270_p2 }
  0x83   : > { %p1273_p10 = pnand %p1272_p4, %p1266_p12 }
  0x85   : > { %1276 = shalt.err (!%p1273_p10)  }
  0x86   : > { %s1277_s29 = scalar_lea.vmem %s1986_s19, 16  ;;  %p1284_p11 = scmp.lt.s32.totalorder %s1986_s19, %s1958_s14 }
  0x87   : > { %p1278_p5 = scmp.ne.s32.totalorder %s1986_s19, %s1277_s29  ;;  %p1285_p8 = scmp.lt.s32.totalorder %s1961_s23, %s1277_s29 }
  0x89   : > { %p1279_p9 = pnand %p1278_p5, %p1123_p6  ;;  %p1286_p13 = por %p1285_p8, %p1284_p11 }
  0x8b   : > { %p1280_p7 = pneg %p1279_p9 }
  0x8d   : > { %p1287_p0 = pnand %p1286_p13, %p1280_p7 }
  0x8f   : > { %1290 = shalt.err (!%p1287_p0)  }
  0x90   : > { %1076 = dma.hbm_to_vmem [thread:$0]  (%p1123_p6), %s334_s13, 16, %s1986_s19, %s1937_s15 }
  0x91   : > { %s1080_s18 = scalar_select %p1123_p6, [#allocation5], [#allocation46] }
  0x92   : > { %s2689_s12 = smov (!%p1123_p6, %s369_s12), 0  ;;  %p350_p12 = scmp.lt.s32.totalorder %s2019_s7, 63 }
  0x93   : > { %p927_p1 = scmp.gt.s32.totalorder %s2019_s7, 0  ;;  %s2051_s1 = sld [smem:[%s1080_s18 + %s2689_s12]] }
  0x94   : > { %s2691_s7 = smov (!%p350_p12, %s2019_s7), 63  ;;  %s390_s21 = sadd.s32 5, %s1897_s25 }
  0x95   : > { %s2693_s7 = smov (!%p927_p1, %s2691_s7), 0 }
  0x96   : > { %s2063_s19 = scalar_select %p1123_p6, [#allocation5], [#allocation47] }
  0x97   : > { %s932_s22 = sshll.u32 %s2693_s7, 4 }
  0x98   : > { %s355_s13 = scalar_lea.hbm %s2592_s2, %s932_s22 }
  0x99   : > { %s1291_s12 = scalar_lea.hbm %s355_s13, 16  ;;  %p1296_p5 = scmp.lt.u32.totalorder %s355_s13, %s2592_s2 }
  0x9a   : > { %p1292_p3 = scmp.ne.s32.totalorder %s355_s13, %s1291_s12  ;;  %p1297_p9 = scmp.lt.u32.totalorder %s1946_s10, %s1291_s12 }
  0x9b   : > { %p1299_p11 = scmp.lt.u32.totalorder %s1291_s12, %s355_s13 }
  0x9c   : > { %p1293_p4 = pnand %p1292_p3, %p1123_p6  ;;  %p1298_p7 = por %p1297_p9, %p1296_p5 }
  0x9e   : > { %p1294_p10 = pneg %p1293_p4  ;;  %p1300_p8 = por %p1299_p11, %p1298_p7 }
  0xa0   : > { %p1301_p13 = pnand %p1300_p8, %p1294_p10 }
  0xa2   : > { %1304 = shalt.err (!%p1301_p13)  }
  0xa3   : > { %s1305_s7 = scalar_lea.vmem %s2056_s20, 16  ;;  %p1312_p3 = scmp.lt.s32.totalorder %s2056_s20, %s1958_s14 }
  0xa4   : > { %p1306_p0 = scmp.ne.s32.totalorder %s2056_s20, %s1305_s7  ;;  %p1313_p4 = scmp.lt.s32.totalorder %s1961_s23, %s1305_s7 }
  0xa6   : > { %p1307_p12 = pnand %p1306_p0, %p1123_p6  ;;  %p1314_p2 = por %p1313_p4, %p1312_p3 }
  0xa8   : > { %p1308_p1 = pneg %p1307_p12 }
  0xaa   : > { %p1315_p5 = pnand %p1314_p2, %p1308_p1 }
  0xac   : > { %1318 = shalt.err (!%p1315_p5)  }
  0xad   : > { %1079 = dma.hbm_to_vmem [thread:$0]  (%p1123_p6), %s355_s13, 16, %s2056_s20, %s1937_s15 }
  0xae   : > { %p2634_p10 = scmp.lt.s32.totalorder %s2051_s1, 63  ;;  %p934_p9 = scmp.gt.s32.totalorder %s2051_s1, 0 }
  0xaf   : > { %s792_s18 = scalar_lea.vmem %s1906_s17, 5 [#allocation2]  ;;  %s2695_s21 = smov (!%p1123_p6, %s390_s21), 0 }
  0xb0   : > { %s372_s29 = scalar_select %p2634_p10, %s2051_s1, 63 }
  0xb1   : > { %s2095_s22 = sld [smem:[%s2063_s19 + %s2695_s21]]  ;;  %s2097_s27 = sshll.u32 %s792_s18, 4  ;;  %s2128_s27 = int_to_ptr.vmem [resolvable:$true] %s2097_s27 }
  0xb2   : > { %s2697_s29 = smov (!%p934_p9, %s372_s29), 0  ;;  %s411_s12 = sadd.s32 6, %s1897_s25 }
  0xb3   : > { %s939_s16 = sshll.u32 %s2697_s29, 4  ;;  %s797_s6 = scalar_lea.vmem %s1906_s17, 6 [#allocation2] }
  0xb4   : > { %s376_s7 = scalar_lea.hbm %s2592_s2, %s939_s16 }
  0xb5   : > { %s1319_s20 = scalar_lea.hbm %s376_s7, 16  ;;  %p1324_p8 = scmp.lt.u32.totalorder %s376_s7, %s2592_s2 }
  0xb6   : > { %p1320_p2 = scmp.ne.s32.totalorder %s376_s7, %s1319_s20  ;;  %p1325_p13 = scmp.lt.u32.totalorder %s1946_s10, %s1319_s20 }
  0xb7   : > { %p1327_p12 = scmp.lt.u32.totalorder %s1319_s20, %s376_s7 }
  0xb8   : > { %p1321_p7 = pnand %p1320_p2, %p1123_p6  ;;  %p1326_p0 = por %p1325_p13, %p1324_p8 }
  0xba   : > { %p1322_p11 = pneg %p1321_p7  ;;  %p1328_p1 = por %p1327_p12, %p1326_p0 }
  0xbc   : > { %p1329_p3 = pnand %p1328_p1, %p1322_p11 }
  0xbe   : > { %1332 = shalt.err (!%p1329_p3)  }
  0xbf   : > { %s1333_s19 = scalar_lea.vmem %s2059_s24, 16  ;;  %p1340_p9 = scmp.lt.s32.totalorder %s2059_s24, %s1958_s14 }
  0xc0   : > { %p1334_p4 = scmp.ne.s32.totalorder %s2059_s24, %s1333_s19  ;;  %p1341_p2 = scmp.lt.s32.totalorder %s1961_s23, %s1333_s19 }
  0xc2   : > { %p1335_p5 = pnand %p1334_p4, %p1123_p6  ;;  %p1342_p7 = por %p1341_p2, %p1340_p9 }
  0xc4   : > { %p1336_p10 = pneg %p1335_p5 }
  0xc6   : > { %p1343_p8 = pnand %p1342_p7, %p1336_p10 }
  0xc8   : > { %1346 = shalt.err (!%p1343_p8)  }
  0xc9   : > { %1082 = dma.hbm_to_vmem [thread:$0]  (%p1123_p6), %s376_s7, 16, %s2059_s24, %s1937_s15 }
  0xca   : > { %s1086_s21 = scalar_select %p1123_p6, [#allocation5], [#allocation48] }
  0xcb   : > { %s2699_s12 = smov (!%p1123_p6, %s411_s12), 0  ;;  %p392_p11 = scmp.lt.s32.totalorder %s2095_s22, 63 }
  0xcc   : > { %p941_p13 = scmp.gt.s32.totalorder %s2095_s22, 0  ;;  %s2130_s29 = sld [smem:[%s1086_s21 + %s2699_s12]] }
  0xcd   : > { %s2701_s22 = smov (!%p392_p11, %s2095_s22), 63  ;;  %s2133_s18 = sshll.u32 %s797_s6, 4  ;;  %s429_s18 = int_to_ptr.vmem [resolvable:$true] %s2133_s18 }
  0xce   : > { %s432_s16 = sadd.s32 7, %s1897_s25  ;;  %s2703_s22 = smov (!%p941_p13, %s2701_s22), 0 }
  0xcf   : > { %s2138_s24 = scalar_select %p1123_p6, [#allocation5], [#allocation49] }
  0xd0   : > { %s946_s0 = sshll.u32 %s2703_s22, 4  ;;  %s802_s5 = scalar_lea.vmem %s1906_s17, 7 [#allocation2] }
  0xd1   : > { %s397_s1 = scalar_lea.hbm %s2592_s2, %s946_s0 }
  0xd2   : > { %s1347_s13 = scalar_lea.hbm %s397_s1, 16  ;;  %p1352_p4 = scmp.lt.u32.totalorder %s397_s1, %s2592_s2 }
  0xd3   : > { %p1348_p12 = scmp.ne.s32.totalorder %s397_s1, %s1347_s13  ;;  %p1353_p5 = scmp.lt.u32.totalorder %s1946_s10, %s1347_s13 }
  0xd4   : > { %p1355_p9 = scmp.lt.u32.totalorder %s1347_s13, %s397_s1 }
  0xd5   : > { %p1349_p1 = pnand %p1348_p12, %p1123_p6  ;;  %p1354_p10 = por %p1353_p5, %p1352_p4 }
  0xd7   : > { %p1350_p3 = pneg %p1349_p1  ;;  %p1356_p2 = por %p1355_p9, %p1354_p10 }
  0xd9   : > { %p1357_p7 = pnand %p1356_p2, %p1350_p3 }
  0xdb   : > { %1360 = shalt.err (!%p1357_p7)  }
  0xdc   : > { %s1361_s22 = scalar_lea.vmem %s2128_s27, 16  ;;  %p1368_p12 = scmp.lt.s32.totalorder %s2128_s27, %s1958_s14 }
  0xdd   : > { %p1362_p8 = scmp.ne.s32.totalorder %s2128_s27, %s1361_s22  ;;  %p1369_p1 = scmp.lt.s32.totalorder %s1961_s23, %s1361_s22 }
  0xdf   : > { %p1363_p11 = pnand %p1362_p8, %p1123_p6  ;;  %p1370_p0 = por %p1369_p1, %p1368_p12 }
  0xe1   : > { %p1364_p13 = pneg %p1363_p11 }
  0xe3   : > { %p1371_p4 = pnand %p1370_p0, %p1364_p13 }
  0xe5   : > { %1374 = shalt.err (!%p1371_p4)  }
  0xe6   : > { %1085 = dma.hbm_to_vmem [thread:$0]  (%p1123_p6), %s397_s1, 16, %s2128_s27, %s1937_s15 }
  0xe7   : > { %p2635_p3 = scmp.lt.s32.totalorder %s2130_s29, 63  ;;  %p948_p5 = scmp.gt.s32.totalorder %s2130_s29, 0 }
  0xe8   : > { %s449_s21 = sshll.u32 %s802_s5, 4  ;;  %s2705_s16 = smov (!%p1123_p6, %s432_s16), 0  ;;  %s2177_s21 = int_to_ptr.vmem [resolvable:$true] %s449_s21 }
  0xe9   : > { %s414_s19 = scalar_select %p2635_p3, %s2130_s29, 63 }
  0xea   : > { %s2172_s0 = sld [smem:[%s2138_s24 + %s2705_s16]] }
  0xeb   : > { %s2707_s19 = smov (!%p948_p5, %s414_s19), 0 }
  0xec   : > { %s953_s7 = sshll.u32 %s2707_s19, 4 }
  0xed   : > { %s418_s12 = scalar_lea.hbm %s2592_s2, %s953_s7 }
  0xee   : > { %s1375_s27 = scalar_lea.hbm %s418_s12, 16  ;;  %p1380_p2 = scmp.lt.u32.totalorder %s418_s12, %s2592_s2 }
  0xef   : > { %p1376_p0 = scmp.ne.s32.totalorder %s418_s12, %s1375_s27  ;;  %p1381_p7 = scmp.lt.u32.totalorder %s1946_s10, %s1375_s27 }
  0xf0   : > { %p1383_p11 = scmp.lt.u32.totalorder %s1375_s27, %s418_s12 }
  0xf1   : > { %p1377_p10 = pnand %p1376_p0, %p1123_p6  ;;  %p1382_p8 = por %p1381_p7, %p1380_p2 }
  0xf3   : > { %p1378_p9 = pneg %p1377_p10  ;;  %p1384_p13 = por %p1383_p11, %p1382_p8 }
  0xf5   : > { %p1385_p12 = pnand %p1384_p13, %p1378_p9 }
  0xf7   : > { %1388 = shalt.err (!%p1385_p12)  }
  0xf8   : > { %s1389_s16 = scalar_lea.vmem %s429_s18, 16  ;;  %p1396_p5 = scmp.lt.s32.totalorder %s429_s18, %s1958_s14 }
  0xf9   : > { %p1390_p1 = scmp.ne.s32.totalorder %s429_s18, %s1389_s16  ;;  %p1397_p0 = scmp.lt.s32.totalorder %s1961_s23, %s1389_s16 }
  0xfb   : > { %p1391_p4 = pnand %p1390_p1, %p1123_p6  ;;  %p1398_p10 = por %p1397_p0, %p1396_p5 }
  0xfd   : > { %p1392_p3 = pneg %p1391_p4 }
  0xff   : > { %p1399_p2 = pnand %p1398_p10, %p1392_p3 }
 0x101   : > { %1402 = shalt.err (!%p1399_p2)  }
 0x102   : > { %1088 = dma.hbm_to_vmem [thread:$0]  (%p1123_p6), %s418_s12, 16, %s429_s18, %s1937_s15 }
 0x103   : > { %s279_s24 = ssub.s32 1, %s2671_s11  ;;  %s1049_s1 = sshll.u32 %s1737_s8, 3 }
 0x104   : > { %s2636_s6 = sadd.s32 1, %s1737_s8  ;;  %s1050_s19 = sadd.s32 8, %s1049_s1 }
 0x105   : > { %p2196_p9 = scmp.lt.s32.totalorder %s2636_s6, 2  ;;  %p434_p7 = scmp.lt.s32.totalorder %s2172_s0, 63 }
 0x106   : > { %p955_p8 = scmp.gt.s32.totalorder %s2172_s0, 0  ;;  %s2203_s7 = sadd.s32 %s1050_s19, %s1897_s25 }
 0x107   : > { %s2637_s22 = scalar_select %p2196_p9, 1, 0 }
 0x108   : > { %s2207_s20 = sshll.u32 %s279_s24, 3  ;;  %s2709_s0 = smov (!%p434_p7, %s2172_s0), 63 }
 0x109   : > { %s1093_s18 = scalar_select %p2196_p9, [#allocation5], [#allocation50] }
 0x10a   : > { %s2711_s0 = smov (!%p955_p8, %s2709_s0), 0 }
 0x10b   : > { %s1094_s13 = scalar_select %p2196_p9, %s2203_s7, 0 }
 0x10c   : > { %s960_s12 = sshll.u32 %s2711_s0, 4 }
 0x10d   : > { %s439_s5 = scalar_lea.hbm %s2592_s2, %s960_s12  ;;  %s2218_s16 = sld [smem:[%s1093_s18 + %s1094_s13]] }
 0x10e   : > { %s1403_s1 = scalar_lea.hbm %s439_s5, 16  ;;  %p1408_p1 = scmp.lt.u32.totalorder %s439_s5, %s2592_s2 }
 0x10f   : > { %p1404_p11 = scmp.ne.s32.totalorder %s439_s5, %s1403_s1  ;;  %p1409_p4 = scmp.lt.u32.totalorder %s1946_s10, %s1403_s1 }
 0x110   : > { %p1411_p5 = scmp.lt.u32.totalorder %s1403_s1, %s439_s5 }
 0x111   : > { %p1405_p13 = pnand %p1404_p11, %p1123_p6  ;;  %p1410_p3 = por %p1409_p4, %p1408_p1 }
 0x113   : > { %p1406_p12 = pneg %p1405_p13  ;;  %p1412_p0 = por %p1411_p5, %p1410_p3 }
 0x115   : > { %p1413_p10 = pnand %p1412_p0, %p1406_p12 }
 0x117   : > { %1416 = shalt.err (!%p1413_p10)  }
 0x118   : > { %s1417_s0 = scalar_lea.vmem %s2177_s21, 16  ;;  %p1424_p11 = scmp.lt.s32.totalorder %s2177_s21, %s1958_s14 }
 0x119   : > { %p1418_p2 = scmp.ne.s32.totalorder %s2177_s21, %s1417_s0  ;;  %p1425_p13 = scmp.lt.s32.totalorder %s1961_s23, %s1417_s0 }
 0x11b   : > { %p1419_p7 = pnand %p1418_p2, %p1123_p6  ;;  %p1426_p9 = por %p1425_p13, %p1424_p11 }
 0x11d   : > { %p1420_p8 = pneg %p1419_p7 }
 0x11f   : > { %p1427_p1 = pnand %p1426_p9, %p1420_p8 }
 0x121   : > { %1430 = shalt.err (!%p1427_p1)  }
 0x122   : > { %1091 = dma.hbm_to_vmem [thread:$0]  (%p1123_p6), %s439_s5, 16, %s2177_s21, %s1937_s15 }
 0x123   : > { %s2238_s19 = scalar_lea.vmem [#allocation2], %s2207_s20  ;;  %s482_s13 = sadd.s32 1, %s2203_s7 }
 0x124   : > { %s478_s18 = sshll.u32 %s2238_s19, 4  ;;  %p2638_p9 = scmp.ne.s32.totalorder %s2637_s22, 0  ;;  %s2248_s18 = int_to_ptr.vmem [resolvable:$true] %s478_s18 }
 0x125   : > { %p462_p12 = scmp.lt.s32.totalorder %s2218_s16, 63  ;;  %p965_p4 = scmp.gt.s32.totalorder %s2218_s16, 0 }
 0x126   : > { %s1096_s12 = scalar_select %p2638_p9, [#allocation5], [#allocation51] }
 0x127   : > { %s2713_s13 = smov (!%p2638_p9, %s482_s13), 0  ;;  %s2715_s16 = smov (!%p462_p12, %s2218_s16), 63 }
 0x128   : > { %s2250_s27 = sld [smem:[%s1096_s12 + %s2713_s13]]  ;;  %s812_s21 = scalar_lea.vmem %s2238_s19, 1 [#allocation2] }
 0x129   : > { %s2717_s16 = smov (!%p965_p4, %s2715_s16), 0  ;;  %s2257_s1 = sshll.u32 %s812_s21, 4  ;;  %s500_s1 = int_to_ptr.vmem [resolvable:$true] %s2257_s1 }
 0x12a   : > { %s1099_s29 = scalar_select %p2638_p9, [#allocation5], [#allocation52] }
 0x12b   : > { %s970_s5 = sshll.u32 %s2717_s16, 4  ;;  %s2265_s30 = scalar_lea.sflag [#allocation3], %s279_s24 }
 0x12c   : > { %s467_s0 = scalar_lea.hbm %s2592_s2, %s970_s5 }
 0x12d   : > { %s1431_s13 = scalar_lea.hbm %s467_s0, 16  ;;  %p1436_p10 = scmp.lt.u32.totalorder %s467_s0, %s2592_s2 }
 0x12e   : > { %p1432_p3 = scmp.ne.s32.totalorder %s467_s0, %s1431_s13  ;;  %p1437_p2 = scmp.lt.u32.totalorder %s1946_s10, %s1431_s13 }
 0x12f   : > { %p1439_p8 = scmp.lt.u32.totalorder %s1431_s13, %s467_s0 }
 0x130   : > { %p1433_p5 = pnand %p1432_p3, %p2638_p9  ;;  %p1438_p7 = por %p1437_p2, %p1436_p10 }
 0x132   : > { %p1434_p0 = pneg %p1433_p5  ;;  %p1440_p11 = por %p1439_p8, %p1438_p7 }
 0x134   : > { %p1441_p13 = pnand %p1440_p11, %p1434_p0 }
 0x136   : > { %1444 = shalt.err (!%p1441_p13)  }
 0x137   : > { %s1445_s11 = scalar_lea.vmem %s2248_s18, 16  ;;  %p1452_p3 = scmp.lt.s32.totalorder %s2248_s18, %s1958_s14 }
 0x138   : > { %p1446_p1 = scmp.ne.s32.totalorder %s2248_s18, %s1445_s11  ;;  %p1453_p5 = scmp.lt.s32.totalorder %s1961_s23, %s1445_s11 }
 0x13a   : > { %p1447_p12 = pnand %p1446_p1, %p2638_p9  ;;  %p1454_p6 = por %p1453_p5, %p1452_p3 }
 0x13c   : > { %p1448_p4 = pneg %p1447_p12 }
 0x13e   : > { %p1455_p2 = pnand %p1454_p6, %p1448_p4 }
 0x140   : > { %1458 = shalt.err (!%p1455_p2)  }
 0x141   : > { %1095 = dma.hbm_to_vmem [thread:$0]  (%p2638_p9), %s467_s0, 16, %s2248_s18, %s2265_s30 }
 0x142   : > { %p2639_p0 = scmp.lt.s32.totalorder %s2250_s27, 63  ;;  %p972_p6 = scmp.gt.s32.totalorder %s2250_s27, 0 }
 0x143   : > { %s817_s16 = scalar_lea.vmem %s2238_s19, 2 [#allocation2]  ;;  %s2640_s21 = sadd.s32 2, %s2203_s7 }
 0x144   : > { %s485_s24 = scalar_select %p2639_p0, %s2250_s27, 63 }
 0x145   : > { %s2719_s21 = smov (!%p2638_p9, %s2640_s21), 0  ;;  %s2299_s25 = sshll.u32 %s817_s16, 4  ;;  %s2329_s25 = int_to_ptr.vmem [resolvable:$true] %s2299_s25 }
 0x146   : > { %s2721_s24 = smov (!%p972_p6, %s485_s24), 0  ;;  %s2297_s20 = sld [smem:[%s1099_s29 + %s2719_s21]] }
 0x147   : > { %s977_s5 = sshll.u32 %s2721_s24, 4  ;;  %s524_s0 = sadd.s32 3, %s2203_s7 }
 0x148   : > { %s489_s18 = scalar_lea.hbm %s2592_s2, %s977_s5 }
 0x149   : > { %s1459_s12 = scalar_lea.hbm %s489_s18, 16  ;;  %p1464_p11 = scmp.lt.u32.totalorder %s489_s18, %s2592_s2 }
 0x14a   : > { %p1460_p10 = scmp.ne.s32.totalorder %s489_s18, %s1459_s12  ;;  %p1465_p13 = scmp.lt.u32.totalorder %s1946_s10, %s1459_s12 }
 0x14b   : > { %p1467_p12 = scmp.lt.u32.totalorder %s1459_s12, %s489_s18 }
 0x14c   : > { %p1461_p7 = pnand %p1460_p10, %p2638_p9  ;;  %p1466_p1 = por %p1465_p13, %p1464_p11 }
 0x14e   : > { %p1462_p8 = pneg %p1461_p7  ;;  %p1468_p4 = por %p1467_p12, %p1466_p1 }
 0x150   : > { %p1469_p3 = pnand %p1468_p4, %p1462_p8 }
 0x152   : > { %1472 = shalt.err (!%p1469_p3)  }
 0x153   : > { %s1473_s29 = scalar_lea.vmem %s500_s1, 16  ;;  %p1480_p6 = scmp.lt.s32.totalorder %s500_s1, %s1958_s14 }
 0x154   : > { %p1474_p5 = scmp.ne.s32.totalorder %s500_s1, %s1473_s29  ;;  %p1481_p10 = scmp.lt.s32.totalorder %s1961_s23, %s1473_s29 }
 0x156   : > { %p1475_p2 = pnand %p1474_p5, %p2638_p9  ;;  %p1482_p7 = por %p1481_p10, %p1480_p6 }
 0x158   : > { %p1476_p0 = pneg %p1475_p2 }
 0x15a   : > { %p1483_p11 = pnand %p1482_p7, %p1476_p0 }
 0x15c   : > { %1486 = shalt.err (!%p1483_p11)  }
 0x15d   : > { %1098 = dma.hbm_to_vmem [thread:$0]  (%p2638_p9), %s489_s18, 16, %s500_s1, %s2265_s30  ;;  %v644_v5 = vlaneseq }
 0x15e   : > { %s1102_s24 = scalar_select %p2638_p9, [#allocation5], [#allocation53] }
 0x15f   : > { %s2723_s0 = smov (!%p2638_p9, %s524_s0), 0  ;;  %p505_p8 = scmp.lt.s32.totalorder %s2297_s20, 63 }
 0x160   : > { %p979_p13 = scmp.gt.s32.totalorder %s2297_s20, 0  ;;  %s2324_s16 = sld [smem:[%s1102_s24 + %s2723_s0]] }
 0x161   : > { %s822_s21 = scalar_lea.vmem %s2238_s19, 3 [#allocation2]  ;;  %s2725_s20 = smov (!%p505_p8, %s2297_s20), 63 }
 0x162   : > { %s541_s5 = sshll.u32 %s822_s21, 4  ;;  %s2727_s20 = smov (!%p979_p13, %s2725_s20), 0  ;;  %s2333_s5 = int_to_ptr.vmem [resolvable:$true] %s541_s5 }
 0x163   : > { %s545_s13 = sadd.s32 4, %s2203_s7  ;;  %s984_s1 = sshll.u32 %s2727_s20, 4 }
 0x164   : > { %s510_s27 = scalar_lea.hbm %s2592_s2, %s984_s1 }
 0x165   : > { %s1487_s0 = scalar_lea.hbm %s510_s27, 16  ;;  %p1492_p5 = scmp.lt.u32.totalorder %s510_s27, %s2592_s2 }
 0x166   : > { %p1488_p12 = scmp.ne.s32.totalorder %s510_s27, %s1487_s0  ;;  %p1493_p2 = scmp.lt.u32.totalorder %s1946_s10, %s1487_s0 }
 0x167   : > { %p1495_p6 = scmp.lt.u32.totalorder %s1487_s0, %s510_s27 }
 0x168   : > { %p1489_p4 = pnand %p1488_p12, %p2638_p9  ;;  %p1494_p0 = por %p1493_p2, %p1492_p5 }
 0x16a   : > { %p1490_p3 = pneg %p1489_p4  ;;  %p1496_p10 = por %p1495_p6, %p1494_p0 }
 0x16c   : > { %p1497_p7 = pnand %p1496_p10, %p1490_p3 }
 0x16e   : > { %1500 = shalt.err (!%p1497_p7)  }
 0x16f   : > { %s1501_s20 = scalar_lea.vmem %s2329_s25, 16  ;;  %p1508_p12 = scmp.lt.s32.totalorder %s2329_s25, %s1958_s14 }
 0x170   : > { %p1502_p11 = scmp.ne.s32.totalorder %s2329_s25, %s1501_s20  ;;  %p1509_p4 = scmp.lt.s32.totalorder %s1961_s23, %s1501_s20 }
 0x172   : > { %p1503_p8 = pnand %p1502_p11, %p2638_p9  ;;  %p1510_p1 = por %p1509_p4, %p1508_p12 }
 0x174   : > { %p1504_p13 = pneg %p1503_p8 }
 0x176   : > { %p1511_p2 = pnand %p1510_p1, %p1504_p13 }
 0x178   : > { %1514 = shalt.err (!%p1511_p2)  }
 0x179   : > { %1101 = dma.hbm_to_vmem [thread:$0]  (%p2638_p9), %s510_s27, 16, %s2329_s25, %s2265_s30  ;;  %v645_v6 = vshrl.u32 %v644_v5, 7  ;;  %v635_v7 = vld [vmem:[%s2594_s4] sm:$0x1]  ;;  %v636_v8 = vld [vmem:[%s2594_s4 + $0x1] sm:$0x1] }
 0x17a   : > { %p2641_p3 = scmp.lt.s32.totalorder %s2324_s16, 63  ;;  %p986_p5 = scmp.gt.s32.totalorder %s2324_s16, 0  ;;  %v638_v9 = vsub.f32 %v636_v8, %v635_v7 }
 0x17b   : > { %s827_s21 = scalar_lea.vmem %s2238_s19, 4 [#allocation2]  ;;  %s2731_s13 = smov (!%p2638_p9, %s545_s13), 0  ;;  %v646_v10 = vsub.s32 0, %v645_v6 }
 0x17c   : > { %s527_s24 = scalar_select %p2641_p3, %s2324_s16, 63 }
 0x17d   : > { %s1105_s1 = scalar_select %p2638_p9, [#allocation5], [#allocation54] }
 0x17e   : > { %s2729_s24 = smov (!%p986_p5, %s527_s24), 0  ;;  %s566_s16 = sadd.s32 5, %s2203_s7 }
 0x17f   : > { %s991_s25 = sshll.u32 %s2729_s24, 4  ;;  %s2377_s6 = sld [smem:[%s1105_s1 + %s2731_s13]] }
 0x180   : > { %s531_s20 = scalar_lea.hbm %s2592_s2, %s991_s25 }
 0x181   : > { %s1515_s18 = scalar_lea.hbm %s531_s20, 16  ;;  %p1520_p10 = scmp.lt.u32.totalorder %s531_s20, %s2592_s2 }
 0x182   : > { %p1516_p1 = scmp.ne.s32.totalorder %s531_s20, %s1515_s18  ;;  %p1521_p7 = scmp.lt.u32.totalorder %s1946_s10, %s1515_s18 }
 0x183   : > { %p1523_p8 = scmp.lt.u32.totalorder %s1515_s18, %s531_s20 }
 0x184   : > { %p1517_p0 = pnand %p1516_p1, %p2638_p9  ;;  %p1522_p11 = por %p1521_p7, %p1520_p10 }
 0x186   : > { %p1518_p6 = pneg %p1517_p0  ;;  %p1524_p13 = por %p1523_p8, %p1522_p11 }
 0x188   : > { %p1525_p12 = pnand %p1524_p13, %p1518_p6 }
 0x18a   : > { %1528 = shalt.err (!%p1525_p12)  }
 0x18b   : > { %s1529_s13 = scalar_lea.vmem %s2333_s5, 16  ;;  %p1536_p5 = scmp.lt.s32.totalorder %s2333_s5, %s1958_s14 }
 0x18c   : > { %p1530_p4 = scmp.ne.s32.totalorder %s2333_s5, %s1529_s13  ;;  %p1537_p1 = scmp.lt.s32.totalorder %s1961_s23, %s1529_s13 }
 0x18e   : > { %p1531_p2 = pnand %p1530_p4, %p2638_p9  ;;  %p1538_p0 = por %p1537_p1, %p1536_p5 }
 0x190   : > { %p1532_p3 = pneg %p1531_p2 }
 0x192   : > { %p1539_p7 = pnand %p1538_p0, %p1532_p3 }
 0x194   : > { %1542 = shalt.err (!%p1539_p7)  }
 0x195   : > { %1104 = dma.hbm_to_vmem [thread:$0]  (%p2638_p9), %s531_s20, 16, %s2333_s5, %s2265_s30  ;;  %v647_v11 = vrot.slane %v638_v9, %v646_v10  ;;  %v652_v12 = vrot.slane %v635_v7, %v646_v10  ;;  %v642_v13 = vpop.permute.xlu0 %641 }
 0x196   : > { %s1108_s24 = scalar_select %p2638_p9, [#allocation5], [#allocation55] }
 0x197   : > { %s2733_s16 = smov (!%p2638_p9, %s566_s16), 0  ;;  %s562_s1 = sshll.u32 %s827_s21, 4  ;;  %v648_v14 = vmul.f32 %v647_v11, %v642_v13  ;;  %s2411_s1 = int_to_ptr.vmem [resolvable:$true] %s562_s1 }
 0x198   : > { %s2642_s11 = sshll.u32 %s1879_s26, 3  ;;  %s2407_s18 = sld [smem:[%s1108_s24 + %s2733_s16]] }
 0x199   : > { %s272_s29 = scalar_lea.vmem %s2593_s3, %s2642_s11  ;;  %p547_p6 = scmp.lt.s32.totalorder %s2377_s6, 63  ;;  %v653_v16 = vadd.f32 %v652_v12, %v648_v14 }
 0x19a   : > { %p993_p10 = scmp.gt.s32.totalorder %s2377_s6, 0  ;;  %s832_s5 = scalar_lea.vmem %s2238_s19, 5 [#allocation2]  ;;  %v637_v15 = vld [vmem:[%s272_s29] sm:$0xff] }
 0x19b   : > { %s2735_s6 = smov (!%p547_p6, %s2377_s6), 63  ;;  %s587_s21 = sadd.s32 6, %s2203_s7  ;;  %v2419_v17 = vadd.f32 %v653_v16, %v637_v15 }
 0x19c   : > { %s1111_s26 = scalar_select %p2638_p9, [#allocation5], [#allocation56] }
 0x19d   : > { %s2737_s6 = smov (!%p993_p10, %s2735_s6), 0  ;;  %s583_s20 = sshll.u32 %s832_s5, 4  ;;  %s584_s20 = int_to_ptr.vmem [resolvable:$true] %s583_s20 }
 0x19e   : > { %s998_s16 = sshll.u32 %s2737_s6, 4 }
 0x19f   : > { %s552_s13 = scalar_lea.hbm %s2592_s2, %s998_s16 }
 0x1a0   : > { %s1543_s24 = scalar_lea.hbm %s552_s13, 16  ;;  %p1548_p2 = scmp.lt.u32.totalorder %s552_s13, %s2592_s2 }
 0x1a1   : > { %p1544_p13 = scmp.ne.s32.totalorder %s552_s13, %s1543_s24  ;;  %p1549_p3 = scmp.lt.u32.totalorder %s1946_s10, %s1543_s24 }
 0x1a2   : > { %p1551_p1 = scmp.lt.u32.totalorder %s1543_s24, %s552_s13 }
 0x1a3   : > { %p1545_p12 = pnand %p1544_p13, %p2638_p9  ;;  %p1550_p5 = por %p1549_p3, %p1548_p2 }
 0x1a5   : > { %p1546_p4 = pneg %p1545_p12  ;;  %p1552_p0 = por %p1551_p1, %p1550_p5 }
 0x1a7   : > { %p1553_p7 = pnand %p1552_p0, %p1546_p4 }
 0x1a9   : > { %1556 = shalt.err (!%p1553_p7)  }
 0x1aa   : > { %s1557_s6 = scalar_lea.vmem %s2411_s1, 16  ;;  %p1564_p12 = scmp.lt.s32.totalorder %s2411_s1, %s1958_s14 }
 0x1ab   : > { %p1558_p6 = scmp.ne.s32.totalorder %s2411_s1, %s1557_s6  ;;  %p1565_p8 = scmp.lt.s32.totalorder %s1961_s23, %s1557_s6 }
 0x1ad   : > { %p1559_p10 = pnand %p1558_p6, %p2638_p9  ;;  %p1566_p11 = por %p1565_p8, %p1564_p12 }
 0x1af   : > { %p1560_p13 = pneg %p1559_p10 }
 0x1b1   : > { %p1567_p2 = pnand %p1566_p11, %p1560_p13 }
 0x1b3   : > { %1570 = shalt.err (!%p1567_p2)  }
 0x1b4   : > { %1107 = dma.hbm_to_vmem [thread:$0]  (%p2638_p9), %s552_s13, 16, %s2411_s1, %s2265_s30 }
 0x1b5   : > { %p2643_p4 = scmp.lt.s32.totalorder %s2407_s18, 63  ;;  %s2739_s21 = smov (!%p2638_p9, %s587_s21), 0 }
 0x1b6   : > { %p2644_p11 = scmp.gt.s32.totalorder %s2407_s18, 0  ;;  %s2452_s29 = sld [smem:[%s1111_s26 + %s2739_s21]] }
 0x1b7   : > { %s569_s27 = scalar_select %p2643_p4, %s2407_s18, 63 }
 0x1b8   : > { %s837_s16 = scalar_lea.vmem %s2238_s19, 6 [#allocation2]  ;;  %s608_s11 = sadd.s32 7, %s2203_s7 }
 0x1b9   : > { %s2741_s27 = smov (!%p2644_p11, %s569_s27), 0 }
 0x1ba   : > { %s1005_s5 = sshll.u32 %s2741_s27, 4 }
 0x1bb   : > { %s573_s24 = scalar_lea.hbm %s2592_s2, %s1005_s5 }
 0x1bc   : > { %s1571_s25 = scalar_lea.hbm %s573_s24, 16  ;;  %p1576_p1 = scmp.lt.u32.totalorder %s573_s24, %s2592_s2 }
 0x1bd   : > { %p1572_p8 = scmp.ne.s32.totalorder %s573_s24, %s1571_s25  ;;  %p1577_p0 = scmp.lt.u32.totalorder %s1946_s10, %s1571_s25 }
 0x1be   : > { %p1579_p6 = scmp.lt.u32.totalorder %s1571_s25, %s573_s24 }
 0x1bf   : > { %p1573_p3 = pnand %p1572_p8, %p2638_p9  ;;  %p1578_p7 = por %p1577_p0, %p1576_p1 }
 0x1c1   : > { %p1574_p5 = pneg %p1573_p3  ;;  %p1580_p10 = por %p1579_p6, %p1578_p7 }
 0x1c3   : > { %p1581_p13 = pnand %p1580_p10, %p1574_p5 }
 0x1c5   : > { %1584 = shalt.err (!%p1581_p13)  }
 0x1c6   : > { %s1585_s26 = scalar_lea.vmem %s584_s20, 16  ;;  %p1592_p11 = scmp.lt.s32.totalorder %s584_s20, %s1958_s14 }
 0x1c7   : > { %p1586_p12 = scmp.ne.s32.totalorder %s584_s20, %s1585_s26  ;;  %p1593_p8 = scmp.lt.s32.totalorder %s1961_s23, %s1585_s26 }
 0x1c9   : > { %p1587_p2 = pnand %p1586_p12, %p2638_p9  ;;  %p1594_p3 = por %p1593_p8, %p1592_p11 }
 0x1cb   : > { %p1588_p4 = pneg %p1587_p2 }
 0x1cd   : > { %p1595_p0 = pnand %p1594_p3, %p1588_p4 }
 0x1cf   : > { %1598 = shalt.err (!%p1595_p0)  }
 0x1d0   : > { %1110 = dma.hbm_to_vmem [thread:$0]  (%p2638_p9), %s573_s24, 16, %s584_s20, %s2265_s30 }
 0x1d1   : > { %s1114_s7 = scalar_select %p2638_p9, [#allocation5], [#allocation57] }
 0x1d2   : > { %s2743_s11 = smov (!%p2638_p9, %s608_s11), 0  ;;  %p589_p5 = scmp.lt.s32.totalorder %s2452_s29, 63 }
 0x1d3   : > { %p1007_p1 = scmp.gt.s32.totalorder %s2452_s29, 0  ;;  %s604_s21 = sshll.u32 %s837_s16, 4  ;;  %s605_s21 = int_to_ptr.vmem [resolvable:$true] %s604_s21 }
 0x1d4   : > { %s2478_s13 = sld [smem:[%s1114_s7 + %s2743_s11]]  ;;  %s2745_s29 = smov (!%p589_p5, %s2452_s29), 63 }
 0x1d5   : > { %s2747_s29 = smov (!%p1007_p1, %s2745_s29), 0  ;;  %s842_s27 = scalar_lea.vmem %s2238_s19, 7 [#allocation2] }
 0x1d6   : > { %s1012_s6 = sshll.u32 %s2747_s29, 4 }
 0x1d7   : > { %s594_s20 = scalar_lea.hbm %s2592_s2, %s1012_s6 }
 0x1d8   : > { %s1599_s0 = scalar_lea.hbm %s594_s20, 16  ;;  %p1604_p12 = scmp.lt.u32.totalorder %s594_s20, %s2592_s2 }
 0x1d9   : > { %p1600_p6 = scmp.ne.s32.totalorder %s594_s20, %s1599_s0  ;;  %p1605_p2 = scmp.lt.u32.totalorder %s1946_s10, %s1599_s0 }
 0x1da   : > { %p1607_p11 = scmp.lt.u32.totalorder %s1599_s0, %s594_s20 }
 0x1db   : > { %p1601_p10 = pnand %p1600_p6, %p2638_p9  ;;  %p1606_p4 = por %p1605_p2, %p1604_p12 }
 0x1dd   : > { %p1602_p13 = pneg %p1601_p10  ;;  %p1608_p8 = por %p1607_p11, %p1606_p4 }
 0x1df   : > { %p1609_p3 = pnand %p1608_p8, %p1602_p13 }
 0x1e1   : > { %1612 = shalt.err (!%p1609_p3)  }
 0x1e2   : > { %s1613_s19 = scalar_lea.vmem %s605_s21, 16  ;;  %p1620_p6 = scmp.lt.s32.totalorder %s605_s21, %s1958_s14 }
 0x1e3   : > { %p1614_p0 = scmp.ne.s32.totalorder %s605_s21, %s1613_s19  ;;  %p1621_p10 = scmp.lt.s32.totalorder %s1961_s23, %s1613_s19 }
 0x1e5   : > { %p1615_p5 = pnand %p1614_p0, %p2638_p9  ;;  %p1622_p7 = por %p1621_p10, %p1620_p6 }
 0x1e7   : > { %p1616_p1 = pneg %p1615_p5 }
 0x1e9   : > { %p1623_p2 = pnand %p1622_p7, %p1616_p1 }
 0x1eb   : > { %1626 = shalt.err (!%p1623_p2)  }
 0x1ec   : > { %1113 = dma.hbm_to_vmem [thread:$0]  (%p2638_p9), %s594_s20, 16, %s605_s21, %s2265_s30 }
 0x1ed   : > { %p2645_p13 = scmp.lt.s32.totalorder %s2478_s13, 63  ;;  %p1014_p12 = scmp.gt.s32.totalorder %s2478_s13, 0 }
 0x1ee   : > { %s625_s11 = sshll.u32 %s842_s27, 4  ;;  %s626_s11 = int_to_ptr.vmem [resolvable:$true] %s625_s11 }
 0x1ef   : > { %s611_s29 = scalar_select %p2645_p13, %s2478_s13, 63 }
 0x1f1   : > { %s2749_s29 = smov (!%p1014_p12, %s611_s29), 0 }
 0x1f2   : > { %s1019_s25 = sshll.u32 %s2749_s29, 4 }
 0x1f3   : > { %s615_s26 = scalar_lea.hbm %s2592_s2, %s1019_s25 }
 0x1f4   : > { %s1627_s7 = scalar_lea.hbm %s615_s26, 16  ;;  %p1632_p8 = scmp.lt.u32.totalorder %s615_s26, %s2592_s2 }
 0x1f5   : > { %p1628_p7 = scmp.ne.s32.totalorder %s615_s26, %s1627_s7  ;;  %p1633_p3 = scmp.lt.u32.totalorder %s1946_s10, %s1627_s7 }
 0x1f6   : > { %p1635_p5 = scmp.lt.u32.totalorder %s1627_s7, %s615_s26 }
 0x1f7   : > { %p1629_p4 = pnand %p1628_p7, %p2638_p9  ;;  %p1634_p0 = por %p1633_p3, %p1632_p8 }
 0x1f9   : > { %p1630_p11 = pneg %p1629_p4  ;;  %p1636_p1 = por %p1635_p5, %p1634_p0 }
 0x1fb   : > { %p1637_p6 = pnand %p1636_p1, %p1630_p11 }
 0x1fd   : > { %1640 = shalt.err (!%p1637_p6)  }
 0x1fe   : > { %s1641_s21 = scalar_lea.vmem %s626_s11, 16  ;;  %p1648_p12 = scmp.lt.s32.totalorder %s626_s11, %s1958_s14 }
 0x1ff   : > { %p1642_p10 = scmp.ne.s32.totalorder %s626_s11, %s1641_s21  ;;  %p1649_p7 = scmp.lt.s32.totalorder %s1961_s23, %s1641_s21 }
 0x201   : > { %p1643_p2 = pnand %p1642_p10, %p2638_p9  ;;  %p1650_p4 = por %p1649_p7, %p1648_p12 }
 0x203   : > { %p1644_p13 = pneg %p1643_p2 }
 0x205   : > { %p1651_p3 = pnand %p1650_p4, %p1644_p13 }
 0x207   : > { %1654 = shalt.err (!%p1651_p3)  }
 0x208   : > { %1116 = dma.hbm_to_vmem [thread:$0]  (%p2638_p9), %s615_s26, 16, %s626_s11, %s2265_s30 }
 0x209   : > { %s260_s10 = scalar_lea.vmem [#allocation6], %s1883_s28 }
 0x20a   : > { %1717 = dma.done.wait %s1937_s15, 128 }
 0x20b   : > { %1718 = vsyncadd %s1937_s15, 4294967168  ;;  %v661_v18 = vld [vmem:[%s1906_s17] sm:$0xff]  ;;  %s2646_s14 = sld [smem:[#allocation62_spill]]  ;;  %s1027_s30 = sshll.u32 %s1741_s9, 1 }
 0x20c   : > { %v662_v19 = vadd.f32 %v661_v18, %v2419_v17  ;;  %s2647_s28 = sld [smem:[#allocation68_spill]]  ;;  %s704_s15 = sadd.s32 %s1737_s8, %s1027_s30 }
 0x20d   : > { %s2648_s17 = sld [smem:[#allocation73_spill]]  ;;  %s2649_s12 = sld [smem:[#allocation74_spill]] }
 0x20e   : > { %663 = vadd.xlane.f32.xlu0 %v662_v19  ;;  %s1028_s20 = sshll.u32 %s704_s15, 7  ;;  %s708_s0 = sshll.u32 %s260_s10, 4  ;;  %s2537_s0 = int_to_ptr.vmem [resolvable:$true] %s708_s0 }
 0x20f   : > { %s2650_s19 = sld [smem:[#allocation75_spill]]  ;;  %s1655_s11 = scalar_lea.vmem %s2537_s0, 128 }
 0x210   : > { %p1656_p9 = scmp.ne.s32.totalorder %s2537_s0, %s1655_s11  ;;  %s1758_s25 = smov [#allocation6]  }
 0x211   : > { %s2651_s8 = sand.u32 1, %s2646_s14   ;;  %s1659_s1 = sshll.u32 %s1758_s25, 4  ;;  %s1660_s1 = int_to_ptr.vmem [resolvable:$false] %s1659_s1 }
 0x212   : > { %s693_s29 = scalar_lea.sflag [#allocation7], %s2651_s8  ;;  %p2652_p11 = scmp.ne.s32.totalorder %s2647_s28, 0 }
 0x213   : > { %v1024_v28 = vld [vmem:[%s2648_s17] ss:$0 sm:$0xff]  ;;  %s1661_s18 = scalar_lea.vmem %s1660_s1, 256  ;;  %p1662_p5 = scmp.lt.s32.totalorder %s2537_s0, %s1660_s1 }
 0x214   : > { %v1025_v30 = vld [vmem:[%s2649_s12] ss:$0 sm:$0xff]  ;;  %p1657_p8 = pnand %p1656_p9, %p2652_p11  ;;  %p1663_p1 = scmp.lt.s32.totalorder %s1661_s18, %s1655_s11 }
 0x215   : > { %s2535_s9 = scalar_lea.hbm %s2650_s19, %s1028_s20 }
 0x216   : > { %p1658_p0 = pneg %p1657_p8  ;;  %p1664_p6 = por %p1663_p1, %p1662_p5 }
 0x218   : > { %p1665_p10 = pnand %p1664_p6, %p1658_p0 }
 0x29b   : > { %v664_v20 = vpop.xlane.xlu0 %663 }
 0x29c   : > { %v666_v21 = vmul.f32 0.0078125, %v664_v20 }
 0x29e   : > { %v667_v22 = vsub.f32 %v662_v19, %v666_v21 }
 0x2a0   : > { %v668_v23 = vmul.f32 %v667_v22, %v667_v22 }
 0x2a2   : > { %669 = vadd.xlane.f32.xlu0 %v668_v23 }
 0x32f   : > { %v670_v24 = vpop.xlane.xlu0 %669 }
 0x330   : > { %v671_v25 = vmul.f32 0.0078125, %v670_v24 }
 0x332   : > { %v672_v26 = vadd.f32 1e-12, %v671_v25 }
 0x334   : > { %1193 = vrsqrt.f32 %v672_v26 }
 0x33e   : > { %v1194_v27 = vpop.eup %1193 }
 0x33f   : > { %v674_v29 = vmul.f32 %v1194_v27, %v667_v22 }
 0x341   : > { %v682_v31 = vmul.f32 %v1024_v28, %v674_v29 }
 0x343   : > { %v690_v32 = vadd.f32 %v1025_v30, %v682_v31 }
 0x345   : > { %691 = vst [vmem:[%s260_s10] sm:$0xff] %v690_v32 }
 0x346   : > { %1668 = shalt.err (!%p1665_p10)
}
 0x347   : > { %s1669_s26 = scalar_lea.hbm %s2535_s9, 128  ;;  %s1673_s5 = scalar_lea.hbm %s2650_s19, 512 }
 0x348   : > { %p1670_p2 = scmp.ne.s32.totalorder %s2535_s9, %s1669_s26  ;;  %p1674_p7 = scmp.lt.u32.totalorder %s2535_s9, %s2650_s19 }
 0x349   : > { %p1675_p4 = scmp.lt.u32.totalorder %s1673_s5, %s1669_s26  ;;  %p1677_p9 = scmp.lt.u32.totalorder %s1669_s26, %s2535_s9 }
 0x34a   : > { %p1671_p13 = pnand %p1670_p2, %p2652_p11 }
 0x34b   : > { %p1676_p3 = por %p1675_p4, %p1674_p7 }
 0x34c   : > { %p1672_p12 = pneg %p1671_p13 }
 0x34d   : > { %p1678_p8 = por %p1677_p9, %p1676_p3 }
 0x34f   : > { %p1679_p0 = pnand %p1678_p8, %p1672_p12 }
 0x351   : > { %1682 = shalt.err (!%p1679_p0)
}
 0x352   : > { %1117 = dma.vmem_to_hbm [thread:$0]  (%p2652_p11), %s2537_s0, 128, %s2535_s9, %s693_s29  }
 0x353 PF: > { %s2653_s14 = sld [smem:[#allocation66_spill]]  ;;  %s2654_s30 = sld [smem:[#allocation61_spill]] }
 0x354   : > { %s2655_s15 = sld [smem:[#allocation70_spill]] }
 0x359   : > { %p1125_p5 = scmp.ge.s32.totalorder %s2653_s14, 2  ;;  %s720_s23 = sand.u32 1, %s2654_s30  }
 0x35a   : > { %p2656_p1 = scmp.ne.s32.totalorder %s2655_s15, 0  ;;  %s721_s22 = scalar_lea.sflag [#allocation7], %s720_s23 }
 0x35c   : > { %p1120_p6 = pnand %p1125_p5, %p2656_p1 }
 0x35e   : > { %1720 = dma.done.wait (!%p1120_p6), %s721_s22, 128  }
 0x35f   : > { %1722 = vsyncadd (!%p1120_p6), %s721_s22, 4294967168  ;;  %s26_s12 = sadd.s32 1, %s2653_s14   ;;  %s2657_s29 = sld [smem:[#allocation62_spill]] }
 0x360   : > { %p23_p10 = scmp.ge.s32.totalorder %s26_s12, 6   ;;  %s2658_s30 = sld [smem:[#allocation63_spill]] }
 0x361   : > { %s2659_s0 = sld [smem:[#allocation71_spill]]  ;;  %s2660_s8 = sld [smem:[#allocation64_spill]] }
 0x362   : > { %s2661_s9 = sld [smem:[#allocation65_spill]]  ;;  %s2662_s10 = sld [smem:[#allocation67_spill]] }
 0x363   : > { %s2663_s11 = sld [smem:[#allocation69_spill]]  ;;  %25 = sbr.rel (!%p23_p10) target bundleno = 22 (0x16), region = 187 }
 0x36a   :  { %726 = vsyncpa [#allocation7], 1 }
 0x36b   :  { %728 = vsyncpa [#allocation7 + $0x1], 1 }
 0x36c   :  { %729 = vsyncmov [#allocation3] }
 0x36f   :  { %s730_s28 = vpop.sfrf %729 }
 0x370   :  { %p1031_p11 = scmp.ne.s32.totalorder %s730_s28, 0 }
 0x372   :  { %734 = shalt.err (%p1031_p11)  }
 0x373   :  { %736 = vsyncmov [#allocation3 + $0x1] }
 0x376   :  { %s737_s17 = vpop.sfrf %736 }
 0x377   :  { %p1032_p2 = scmp.ne.s32.totalorder %s737_s17, 0 }
 0x379   :  { %741 = shalt.err (%p1032_p2)  }

</bundles_post_ra>
